<compile_context>
chip_gen: v7x
topology: tpu7x:2x2x1
jax: 0.10.0
libtpu: 0.0.40
codegen_flags: <defaults>
</compile_context>

<pallas_src>
import functools

import jax
import jax.numpy as jnp
from jax.experimental import pallas as pl
from jax.experimental.pallas import tpu as pltpu


def _round_up(n, m):
    return (n + m - 1) // m * m


@functools.lru_cache(maxsize=None)
def _default_vmem_limit_bytes():
    """~75% of physical VMEM (48 MiB on v7x), capped at 96 MiB (v5e/v6e)."""
    cap = 128 * 1024 * 1024
    try:
        cap = int(pltpu.get_tpu_info().vmem_capacity_bytes)
    except Exception:
        pass
    return int(min(96 * 1024 * 1024, (cap * 3) // 4))


def _pick_tm(batch, requested):
    """Batch tile: multiple of 8, <= requested, limited padding waste, halved
    until the batch grid has >= 2 steps (so both v7x TensorCores get work)."""
    b8 = _round_up(max(batch, 1), 8)
    cap = max(8, min(_round_up(requested, 8), b8))
    tm = cap
    for cand in (512, 256, 128, 64, 32, 16, 8):
        if cand > cap:
            continue
        if _round_up(batch, cand) - batch <= max(0.10 * batch, 32):
            tm = cand
            break
    while tm > 8 and (b8 + tm - 1) // tm < 2:
        tm = max(8, tm // 2)
    return _round_up(tm, 8)


def _pick_tn(out_pad):
    """N (out-feature) tile: whole width when small, else a 128-multiple tile."""
    if out_pad <= 512:
        return out_pad
    for cand in (512, 256):
        if out_pad % cand == 0:
            return cand
    return 128


# ----------------------------- kernels --------------------------------------


def _fc1_into_scratch(x_ref, w1_ref, b1_ref, h_ref):
    """h = relu(x @ W1 + b1), computed once per batch tile (n-step j == 0)."""
    @pl.when(pl.program_id(1) == 0)
    def _():
        h = jnp.dot(x_ref[...], w1_ref[...], preferred_element_type=jnp.float32)
        h_ref[...] = jnp.maximum(h + b1_ref[...], 0.0).astype(h_ref.dtype)


def _resblock_proj_kernel(x_ref, w1_ref, b1_ref, w2_ref, ws_ref, b2s_ref,
                          o_ref, h_ref):
    """Projection shortcut: relu(h @ W2[:, j] + (b2 + bs)[j] + x @ Ws[:, j])."""
    _fc1_into_scratch(x_ref, w1_ref, b1_ref, h_ref)
    shortcut = jnp.dot(x_ref[...], ws_ref[...], preferred_element_type=jnp.float32)
    out = jnp.dot(h_ref[...], w2_ref[...], preferred_element_type=jnp.float32)
    o_ref[...] = jnp.maximum(out + b2s_ref[...] + shortcut, 0.0).astype(o_ref.dtype)


def _resblock_id_full_kernel(x_ref, w1_ref, b1_ref, w2_ref, b2_ref, o_ref, h_ref):
    """Identity shortcut, single N tile: the x block itself is the identity."""
    _fc1_into_scratch(x_ref, w1_ref, b1_ref, h_ref)
    out = jnp.dot(h_ref[...], w2_ref[...], preferred_element_type=jnp.float32)
    o_ref[...] = jnp.maximum(out + b2_ref[...] + x_ref[...].astype(jnp.float32),
                             0.0).astype(o_ref.dtype)


def _resblock_id_tiled_kernel(x_ref, xid_ref, w1_ref, b1_ref, w2_ref, b2_ref,
                              o_ref, h_ref):
    """Identity shortcut, N-tiled: xid_ref is the (tm, tn) slice of x for tile j."""
    _fc1_into_scratch(x_ref, w1_ref, b1_ref, h_ref)
    out = jnp.dot(h_ref[...], w2_ref[...], preferred_element_type=jnp.float32)
    o_ref[...] = jnp.maximum(out + b2_ref[...] + xid_ref[...].astype(jnp.float32),
                             0.0).astype(o_ref.dtype)


# ----------------------------- host wrappers ---------------------------------


def pack_params(w1, b1, w2, b2, ws=None, bs=None, *, compute_dtype=jnp.float32):
    """Pad/pack the parameters ONCE (hoisted out of the per-call jitted path).

    Weights are stored pre-transposed as [in_features, out_features]; feature
    axes are zero-padded to multiples of 128 (lane-dense, mathematically exact).
    For the projection shortcut the shortcut bias is folded into b2.
    compute_dtype=jnp.bfloat16 feeds the MXU bf16 operands (f32 accumulation)
    on all TPU generations; f32 matches the torch reference exactly.
    """
    in_f, out_f = w1.shape
    has_proj = ws is not None
    in_pad = _round_up(in_f, 128)
    out_pad = _round_up(out_f, 128)
    if not has_proj:
        assert in_f == out_f, "Identity shortcut requires in_features == out_features"
        in_pad = out_pad
    f32 = jnp.float32

    w1_p = jnp.zeros((in_pad, out_pad), compute_dtype).at[:in_f, :out_f].set(
        w1.astype(compute_dtype))
    w2_p = jnp.zeros((out_pad, out_pad), compute_dtype).at[:out_f, :out_f].set(
        w2.astype(compute_dtype))
    b1_p = jnp.zeros((1, out_pad), f32).at[:, :out_f].set(
        b1.reshape(1, -1).astype(f32))
    if has_proj:
        ws_p = jnp.zeros((in_pad, out_pad), compute_dtype).at[:in_f, :out_f].set(
            ws.astype(compute_dtype))
        b2_fold = (b2.astype(f32) + bs.astype(f32)).reshape(1, -1)
    else:
        ws_p = None
        b2_fold = b2.reshape(1, -1).astype(f32)
    b2_p = jnp.zeros((1, out_pad), f32).at[:, :out_f].set(b2_fold)

    return dict(w1=w1_p, b1=b1_p, w2=w2_p, b2=b2_p, ws=ws_p,
                in_features=in_f, out_features=out_f)


@functools.partial(jax.jit,
                   static_argnames=("out_features", "tm", "single_buffer_weights"))
def _resblock_forward(x, w1_p, b1_p, w2_p, b2_p, ws_p, *,
                      out_features, tm, single_buffer_weights):
    B, in_f = x.shape
    in_pad, out_pad = w1_p.shape
    has_proj = ws_p is not None
    compute_dtype = w1_p.dtype
    out_f = out_features

    tn = _pick_tn(out_pad)
    tm_eff = _pick_tm(B, tm)
    B_pad = _round_up(B, tm_eff)
    grid_m = B_pad // tm_eff
    grid_n = out_pad // tn

    # Pad x only when actually needed (the pad is an extra HBM read+write of x).
    if B_pad == B and in_pad == in_f and x.dtype == compute_dtype:
        x_p = x
    else:
        x_p = jnp.zeros((B_pad, in_pad), compute_dtype).at[:B, :in_f].set(
            x.astype(compute_dtype))

    def spec(shape, index_map, *, constant=False):
        # Single-buffer grid-invariant operands (halves their VMEM footprint);
        # default double-buffering for anything whose block index changes.
        if constant and single_buffer_weights:
            return pl.BlockSpec(shape, index_map, pipeline_mode=pl.Buffered(1))
        return pl.BlockSpec(shape, index_map)

    x_spec = spec((tm_eff, in_pad), lambda i, j: (i, 0), constant=(grid_m == 1))
    w1_spec = spec((in_pad, out_pad), lambda i, j: (0, 0), constant=True)
    b1_spec = spec((1, out_pad), lambda i, j: (0, 0), constant=True)
    w2_spec = spec((out_pad, tn), lambda i, j: (0, j), constant=(grid_n == 1))
    b2_spec = spec((1, tn), lambda i, j: (0, j), constant=(grid_n == 1))

    if has_proj:
        ws_spec = spec((in_pad, tn), lambda i, j: (0, j), constant=(grid_n == 1))
        kernel = _resblock_proj_kernel
        in_specs = [x_spec, w1_spec, b1_spec, w2_spec, ws_spec, b2_spec]
        args = (x_p, w1_p, b1_p, w2_p, ws_p, b2_p)
    elif grid_n == 1:
        kernel = _resblock_id_full_kernel
        in_specs = [x_spec, w1_spec, b1_spec, w2_spec, b2_spec]
        args = (x_p, w1_p, b1_p, w2_p, b2_p)
    else:
        # N-tiled identity: give the kernel an extra (tm, tn) view of x for the
        # residual add (avoids dynamic lane-dim slicing inside the kernel).
        xid_spec = spec((tm_eff, tn), lambda i, j: (i, j))
        kernel = _resblock_id_tiled_kernel
        in_specs = [x_spec, xid_spec, w1_spec, b1_spec, w2_spec, b2_spec]
        args = (x_p, x_p, w1_p, b1_p, w2_p, b2_p)

    y = pl.pallas_call(
        kernel,
        out_shape=jax.ShapeDtypeStruct((B_pad, out_pad), jnp.float32),
        grid_spec=pltpu.PrefetchScalarGridSpec(
            num_scalar_prefetch=0,
            grid=(grid_m, grid_n),
            in_specs=in_specs,
            out_specs=pl.BlockSpec((tm_eff, tn), lambda i, j: (i, j)),
            scratch_shapes=[pltpu.VMEM((tm_eff, out_pad), compute_dtype)],
        ),
        compiler_params=pltpu.CompilerParams(
            # Batch tiles shard across TensorCores (v7x); the N axis is serial
            # ("arbitrary") because the h scratch written at j == 0 is reused
            # for j > 0 of the same batch tile.
            dimension_semantics=("parallel", "arbitrary"),
            vmem_limit_bytes=_default_vmem_limit_bytes(),
        ),
    )(*args)

    if B_pad == B and out_pad == out_f:
        return y
    return y[:B, :out_f]


def residual_block_packed(x, packed, *, tm=256):
    """Forward pass from pre-packed params (see pack_params). Returns [B, out_f] f32."""
    args = (x, packed["w1"], packed["b1"], packed["w2"], packed["b2"], packed["ws"])
    kwargs = dict(out_features=packed["out_features"], tm=tm)
    try:
        return _resblock_forward(*args, single_buffer_weights=True, **kwargs)
    except Exception:
        # Fallback if this JAX build rejects pl.Buffered(1) single-buffering.
        return _resblock_forward(*args, single_buffer_weights=False, **kwargs)


def residual_block(x, w1, b1, w2, b2, ws=None, bs=None, *, tm=256,
                   compute_dtype=jnp.float32):
    """One-shot convenience wrapper (packs params per call). For repeated calls,
    pack once with pack_params() and use residual_block_packed()."""
    packed = pack_params(w1, b1, w2, b2, ws, bs, compute_dtype=compute_dtype)
    return residual_block_packed(x, packed, tm=tm)


# ----------------------------- reference & demo ------------------------------


def init_params(key, in_features, out_features):
    """nn.Linear-style U(-1/sqrt(fan_in), +) init. Weights stored as [in, out]."""
    ks = jax.random.split(key, 6)

    def linear_init(kw, kb, fan_in, fan_out):
        bound = 1.0 / (fan_in ** 0.5)
        w = jax.random.uniform(kw, (fan_in, fan_out), jnp.float32, -bound, bound)
        b = jax.random.uniform(kb, (fan_out,), jnp.float32, -bound, bound)
        return w, b

    w1, b1 = linear_init(ks[0], ks[1], in_features, out_features)
    w2, b2 = linear_init(ks[2], ks[3], out_features, out_features)
    if in_features != out_features:
        ws, bs = linear_init(ks[4], ks[5], in_features, out_features)
    else:
        ws, bs = None, None  # nn.Identity shortcut
    return w1, b1, w2, b2, ws, bs


def reference(x, w1, b1, w2, b2, ws=None, bs=None):
    h = jnp.maximum(x @ w1 + b1, 0.0)
    out = h @ w2 + b2
    identity = (x @ ws + bs) if ws is not None else x
    return jnp.maximum(out + identity, 0.0)


if __name__ == "__main__":
    key = jax.random.PRNGKey(0)
    keys = jax.random.split(key, 8)

    # Case 1: in_features != out_features -> Linear (projection) shortcut.
    B, in_f, out_f = 16, 32, 64
    x1 = jax.random.normal(keys[0], (B, in_f), jnp.float32)
    p1 = init_params(keys[1], in_f, out_f)
    packed1 = pack_params(*p1)                       # pack once, reuse
    out1 = jax.block_until_ready(residual_block_packed(x1, packed1))
    ref1 = reference(x1, *p1)
    assert out1.shape == (B, out_f)
    assert jnp.allclose(out1, ref1, atol=1e-5, rtol=1e-5), "mismatch (projection)"

    # Case 2: in_features == out_features -> Identity shortcut.
    feat = 64
    x2 = jax.random.normal(keys[2], (B, feat), jnp.float32)
    p2 = init_params(keys[3], feat, feat)
    out2 = jax.block_until_ready(residual_block(x2, *p2))
    ref2 = reference(x2, *p2)
    assert out2.shape == (B, feat)
    assert jnp.allclose(out2, ref2, atol=1e-5, rtol=1e-5), "mismatch (identity)"

    # Case 3: unaligned shapes + N-tiled weights (out_pad > 512 => grid_n > 1),
    # projection shortcut.
    B3, in3, out3 = 50, 200, 640
    x3 = jax.random.normal(keys[4], (B3, in3), jnp.float32)
    p3 = init_params(keys[5], in3, out3)
    y3 = jax.block_until_ready(residual_block(x3, *p3))
    ref3 = reference(x3, *p3)
    assert y3.shape == (B3, out3)
    assert jnp.allclose(y3, ref3, atol=1e-4, rtol=1e-4), "mismatch (proj, N-tiled)"

    # Case 4: N-tiled identity shortcut (exercises the per-tile residual view).
    B4, feat4 = 24, 640
    x4 = jax.random.normal(keys[6], (B4, feat4), jnp.float32)
    p4 = init_params(keys[7], feat4, feat4)
    y4 = jax.block_until_ready(residual_block(x4, *p4))
    ref4 = reference(x4, *p4)
    assert y4.shape == (B4, feat4)
    assert jnp.allclose(y4, ref4, atol=1e-4, rtol=1e-4), "mismatch (identity, N-tiled)"

    # Case 5: bf16 MXU operands (f32 accumulation) — looser tolerance vs f32 ref.
    y5 = jax.block_until_ready(residual_block(x1, *p1, compute_dtype=jnp.bfloat16))
    assert y5.shape == (B, out_f)
    assert jnp.allclose(y5, ref1, atol=1e-1, rtol=1e-1), "mismatch (bf16)"

    print("KERNEL_OK")
</pallas_src>

<mosaic_0001>
module attributes {stable_mosaic.version = 11 : i64} {
  func.func @_resblock_proj_kernel(%arg0: i32, %arg1: i32, %arg2: memref<8x128xf32, #tpu.memory_space<vmem>>, %arg3: memref<128x128xf32, #tpu.memory_space<vmem>>, %arg4: memref<1x128xf32, #tpu.memory_space<vmem>>, %arg5: memref<128x128xf32, #tpu.memory_space<vmem>>, %arg6: memref<128x128xf32, #tpu.memory_space<vmem>>, %arg7: memref<1x128xf32, #tpu.memory_space<vmem>>, %arg8: memref<8x128xf32, #tpu.memory_space<vmem>>, %arg9: memref<8x128xf32, #tpu.memory_space<vmem>>) attributes {dimension_semantics = [#tpu.dimension_semantics<parallel>, #tpu.dimension_semantics<arbitrary>], iteration_bounds = array<i64: 2, 1>, scalar_prefetch = 0 : i64, scratch_operands = 1 : i64, tpu.core_type = #tpu.core_type<tc>, window_params = [{transform_indices = @transform_0, window_bounds = array<i64: 8, 128>}, {pipeline_mode = #tpu.pipeline_mode<synchronous>, transform_indices = @transform_1, window_bounds = array<i64: 128, 128>}, {pipeline_mode = #tpu.pipeline_mode<synchronous>, transform_indices = @transform_2, window_bounds = array<i64: 1, 128>}, {pipeline_mode = #tpu.pipeline_mode<synchronous>, transform_indices = @transform_3, window_bounds = array<i64: 128, 128>}, {pipeline_mode = #tpu.pipeline_mode<synchronous>, transform_indices = @transform_4, window_bounds = array<i64: 128, 128>}, {pipeline_mode = #tpu.pipeline_mode<synchronous>, transform_indices = @transform_5, window_bounds = array<i64: 1, 128>}, {transform_indices = @transform_6, window_bounds = array<i64: 8, 128>}]} {
    %c0_i32 = arith.constant 0 : i32
    %0 = arith.cmpi eq, %arg1, %c0_i32 : i32
    %1 = arith.extui %0 : i1 to i32
    %c0_i32_0 = arith.constant 0 : i32
    %2 = arith.cmpi ne, %1, %c0_i32_0 : i32
    scf.if %2 {
      %c0_14 = arith.constant 0 : index
      %c0_15 = arith.constant 0 : index
      %16 = vector.load %arg2[%c0_14, %c0_15] : memref<8x128xf32, #tpu.memory_space<vmem>>, vector<8x128xf32>
      %c0_16 = arith.constant 0 : index
      %c0_17 = arith.constant 0 : index
      %17 = vector.load %arg3[%c0_16, %c0_17] : memref<128x128xf32, #tpu.memory_space<vmem>>, vector<128x128xf32>
      %cst_18 = arith.constant dense<0.000000e+00> : vector<8x128xf32>
      %18 = tpu.matmul %16, %17, %cst_18 {dimension_numbers = #tpu.dot_dimension_numbers<[1], [0], [0], [1], [0, 0, 1, 1], [], []>} : vector<8x128xf32>, vector<128x128xf32>, vector<8x128xf32> -> vector<8x128xf32>
      %c0_19 = arith.constant 0 : index
      %c0_20 = arith.constant 0 : index
      %19 = vector.load %arg4[%c0_19, %c0_20] : memref<1x128xf32, #tpu.memory_space<vmem>>, vector<1x128xf32>
      %20 = vector.broadcast %19 : vector<1x128xf32> to vector<8x128xf32>
      %21 = arith.addf %18, %20 : vector<8x128xf32>
      %cst_21 = arith.constant 0.000000e+00 : f32
      %22 = vector.broadcast %cst_21 : f32 to vector<8x128xf32>
      %23 = arith.maximumf %21, %22 : vector<8x128xf32>
      %c0_22 = arith.constant 0 : index
      %c0_23 = arith.constant 0 : index
      %24 = vector.load %arg9[%c0_22, %c0_23] : memref<8x128xf32, #tpu.memory_space<vmem>>, vector<8x128xf32>
      tpu.vector_store %arg9[%c0_22, %c0_23], %23 {strides = array<i32>} : memref<8x128xf32, #tpu.memory_space<vmem>>, vector<8x128xf32>,
    } else {
    }
    %c0 = arith.constant 0 : index
    %c0_1 = arith.constant 0 : index
    %3 = vector.load %arg2[%c0, %c0_1] : memref<8x128xf32, #tpu.memory_space<vmem>>, vector<8x128xf32>
    %c0_2 = arith.constant 0 : index
    %c0_3 = arith.constant 0 : index
    %4 = vector.load %arg6[%c0_2, %c0_3] : memref<128x128xf32, #tpu.memory_space<vmem>>, vector<128x128xf32>
    %cst = arith.constant dense<0.000000e+00> : vector<8x128xf32>
    %5 = tpu.matmul %3, %4, %cst {dimension_numbers = #tpu.dot_dimension_numbers<[1], [0], [0], [1], [0, 0, 1, 1], [], []>} : vector<8x128xf32>, vector<128x128xf32>, vector<8x128xf32> -> vector<8x128xf32>
    %c0_4 = arith.constant 0 : index
    %c0_5 = arith.constant 0 : index
    %6 = vector.load %arg9[%c0_4, %c0_5] : memref<8x128xf32, #tpu.memory_space<vmem>>, vector<8x128xf32>
    %c0_6 = arith.constant 0 : index
    %c0_7 = arith.constant 0 : index
    %7 = vector.load %arg5[%c0_6, %c0_7] : memref<128x128xf32, #tpu.memory_space<vmem>>, vector<128x128xf32>
    %cst_8 = arith.constant dense<0.000000e+00> : vector<8x128xf32>
    %8 = tpu.matmul %6, %7, %cst_8 {dimension_numbers = #tpu.dot_dimension_numbers<[1], [0], [0], [1], [0, 0, 1, 1], [], []>} : vector<8x128xf32>, vector<128x128xf32>, vector<8x128xf32> -> vector<8x128xf32>
    %c0_9 = arith.constant 0 : index
    %c0_10 = arith.constant 0 : index
    %9 = vector.load %arg7[%c0_9, %c0_10] : memref<1x128xf32, #tpu.memory_space<vmem>>, vector<1x128xf32>
    %10 = vector.broadcast %9 : vector<1x128xf32> to vector<8x128xf32>
    %11 = arith.addf %8, %10 : vector<8x128xf32>
    %12 = arith.addf %11, %5 : vector<8x128xf32>
    %cst_11 = arith.constant 0.000000e+00 : f32
    %13 = vector.broadcast %cst_11 : f32 to vector<8x128xf32>
    %14 = arith.maximumf %12, %13 : vector<8x128xf32>
    %c0_12 = arith.constant 0 : index
    %c0_13 = arith.constant 0 : index
    %15 = vector.load %arg8[%c0_12, %c0_13] : memref<8x128xf32, #tpu.memory_space<vmem>>, vector<8x128xf32>
    tpu.vector_store %arg8[%c0_12, %c0_13], %14 {strides = array<i32>} : memref<8x128xf32, #tpu.memory_space<vmem>>, vector<8x128xf32>,
    return
  }
  func.func @transform_0(%arg0: i32, %arg1: i32) -> (i32, i32) {
    %c0_i32 = arith.constant 0 : i32
    %c0_i32_0 = arith.constant 0 : i32
    return %arg0, %c0_i32 : i32, i32
  }
  func.func @transform_1(%arg0: i32, %arg1: i32) -> (i32, i32) {
    %c0_i32 = arith.constant 0 : i32
    %c0_i32_0 = arith.constant 0 : i32
    %c0_i32_1 = arith.constant 0 : i32
    return %c0_i32, %c0_i32_0 : i32, i32
  }
  func.func @transform_2(%arg0: i32, %arg1: i32) -> (i32, i32) {
    %c0_i32 = arith.constant 0 : i32
    %c0_i32_0 = arith.constant 0 : i32
    %c0_i32_1 = arith.constant 0 : i32
    return %c0_i32, %c0_i32_0 : i32, i32
  }
  func.func @transform_3(%arg0: i32, %arg1: i32) -> (i32, i32) {
    %c0_i32 = arith.constant 0 : i32
    %c0_i32_0 = arith.constant 0 : i32
    return %c0_i32, %arg1 : i32, i32
  }
  func.func @transform_4(%arg0: i32, %arg1: i32) -> (i32, i32) {
    %c0_i32 = arith.constant 0 : i32
    %c0_i32_0 = arith.constant 0 : i32
    return %c0_i32, %arg1 : i32, i32
  }
  func.func @transform_5(%arg0: i32, %arg1: i32) -> (i32, i32) {
    %c0_i32 = arith.constant 0 : i32
    %c0_i32_0 = arith.constant 0 : i32
    return %c0_i32, %arg1 : i32, i32
  }
  func.func @transform_6(%arg0: i32, %arg1: i32) -> (i32, i32) {
    %c0_i32 = arith.constant 0 : i32
    return %arg0, %arg1 : i32, i32
  }
}

module attributes {stable_mosaic.version = 11 : i64} {
  func.func @_resblock_proj_kernel(%arg0: i32, %arg1: i32, %arg2: memref<8x128xf32, #tpu.memory_space<vmem>>, %arg3: memref<128x128xf32, #tpu.memory_space<vmem>>, %arg4: memref<1x128xf32, #tpu.memory_space<vmem>>, %arg5: memref<128x128xf32, #tpu.memory_space<vmem>>, %arg6: memref<128x128xf32, #tpu.memory_space<vmem>>, %arg7: memref<1x128xf32, #tpu.memory_space<vmem>>, %arg8: memref<8x128xf32, #tpu.memory_space<vmem>>, %arg9: memref<8x128xf32, #tpu.memory_space<vmem>>) attributes {dimension_semantics = [#tpu.dimension_semantics<parallel>, #tpu.dimension_semantics<arbitrary>], iteration_bounds = array<i64: 2, 1>, scalar_prefetch = 0 : i64, scratch_operands = 1 : i64, tpu.core_type = #tpu.core_type<tc>, window_params = [{transform_indices = @transform_0, window_bounds = array<i64: 8, 128>}, {pipeline_mode = #tpu.pipeline_mode<synchronous>, transform_indices = @transform_1, window_bounds = array<i64: 128, 128>}, {pipeline_mode = #tpu.pipeline_mode<synchronous>, transform_indices = @transform_2, window_bounds = array<i64: 1, 128>}, {transform_indices = @transform_3, window_bounds = array<i64: 128, 128>}, {transform_indices = @transform_4, window_bounds = array<i64: 128, 128>}, {transform_indices = @transform_5, window_bounds = array<i64: 1, 128>}, {transform_indices = @transform_6, window_bounds = array<i64: 8, 128>}]} {
    %c0_i32 = arith.constant 0 : i32
    %0 = arith.cmpi eq, %arg1, %c0_i32 : i32
    %1 = arith.extui %0 : i1 to i32
    %c0_i32_0 = arith.constant 0 : i32
    %2 = arith.cmpi ne, %1, %c0_i32_0 : i32
    scf.if %2 {
      %c0_14 = arith.constant 0 : index
      %c0_15 = arith.constant 0 : index
      %16 = vector.load %arg2[%c0_14, %c0_15] : memref<8x128xf32, #tpu.memory_space<vmem>>, vector<8x128xf32>
      %c0_16 = arith.constant 0 : index
      %c0_17 = arith.constant 0 : index
      %17 = vector.load %arg3[%c0_16, %c0_17] : memref<128x128xf32, #tpu.memory_space<vmem>>, vector<128x128xf32>
      %cst_18 = arith.constant dense<0.000000e+00> : vector<8x128xf32>
      %18 = tpu.matmul %16, %17, %cst_18 {dimension_numbers = #tpu.dot_dimension_numbers<[1], [0], [0], [1], [0, 0, 1, 1], [], []>} : vector<8x128xf32>, vector<128x128xf32>, vector<8x128xf32> -> vector<8x128xf32>
      %c0_19 = arith.constant 0 : index
      %c0_20 = arith.constant 0 : index
      %19 = vector.load %arg4[%c0_19, %c0_20] : memref<1x128xf32, #tpu.memory_space<vmem>>, vector<1x128xf32>
      %20 = vector.broadcast %19 : vector<1x128xf32> to vector<8x128xf32>
      %21 = arith.addf %18, %20 : vector<8x128xf32>
      %cst_21 = arith.constant 0.000000e+00 : f32
      %22 = vector.broadcast %cst_21 : f32 to vector<8x128xf32>
      %23 = arith.maximumf %21, %22 : vector<8x128xf32>
      %c0_22 = arith.constant 0 : index
      %c0_23 = arith.constant 0 : index
      %24 = vector.load %arg9[%c0_22, %c0_23] : memref<8x128xf32, #tpu.memory_space<vmem>>, vector<8x128xf32>
      tpu.vector_store %arg9[%c0_22, %c0_23], %23 {strides = array<i32>} : memref<8x128xf32, #tpu.memory_space<vmem>>, vector<8x128xf32>,
    } else {
    }
    %c0 = arith.constant 0 : index
    %c0_1 = arith.constant 0 : index
    %3 = vector.load %arg2[%c0, %c0_1] : memref<8x128xf32, #tpu.memory_space<vmem>>, vector<8x128xf32>
    %c0_2 = arith.constant 0 : index
    %c0_3 = arith.constant 0 : index
    %4 = vector.load %arg6[%c0_2, %c0_3] : memref<128x128xf32, #tpu.memory_space<vmem>>, vector<128x128xf32>
    %cst = arith.constant dense<0.000000e+00> : vector<8x128xf32>
    %5 = tpu.matmul %3, %4, %cst {dimension_numbers = #tpu.dot_dimension_numbers<[1], [0], [0], [1], [0, 0, 1, 1], [], []>} : vector<8x128xf32>, vector<128x128xf32>, vector<8x128xf32> -> vector<8x128xf32>
    %c0_4 = arith.constant 0 : index
    %c0_5 = arith.constant 0 : index
    %6 = vector.load %arg9[%c0_4, %c0_5] : memref<8x128xf32, #tpu.memory_space<vmem>>, vector<8x128xf32>
    %c0_6 = arith.constant 0 : index
    %c0_7 = arith.constant 0 : index
    %7 = vector.load %arg5[%c0_6, %c0_7] : memref<128x128xf32, #tpu.memory_space<vmem>>, vector<128x128xf32>
    %cst_8 = arith.constant dense<0.000000e+00> : vector<8x128xf32>
    %8 = tpu.matmul %6, %7, %cst_8 {dimension_numbers = #tpu.dot_dimension_numbers<[1], [0], [0], [1], [0, 0, 1, 1], [], []>} : vector<8x128xf32>, vector<128x128xf32>, vector<8x128xf32> -> vector<8x128xf32>
    %c0_9 = arith.constant 0 : index
    %c0_10 = arith.constant 0 : index
    %9 = vector.load %arg7[%c0_9, %c0_10] : memref<1x128xf32, #tpu.memory_space<vmem>>, vector<1x128xf32>
    %10 = vector.broadcast %9 : vector<1x128xf32> to vector<8x128xf32>
    %11 = arith.addf %8, %10 : vector<8x128xf32>
    %12 = arith.addf %11, %5 : vector<8x128xf32>
    %cst_11 = arith.constant 0.000000e+00 : f32
    %13 = vector.broadcast %cst_11 : f32 to vector<8x128xf32>
    %14 = arith.maximumf %12, %13 : vector<8x128xf32>
    %c0_12 = arith.constant 0 : index
    %c0_13 = arith.constant 0 : index
    %15 = vector.load %arg8[%c0_12, %c0_13] : memref<8x128xf32, #tpu.memory_space<vmem>>, vector<8x128xf32>
    tpu.vector_store %arg8[%c0_12, %c0_13], %14 {strides = array<i32>} : memref<8x128xf32, #tpu.memory_space<vmem>>, vector<8x128xf32>,
    return
  }
  func.func @transform_0(%arg0: i32, %arg1: i32) -> (i32, i32) {
    %c0_i32 = arith.constant 0 : i32
    %c0_i32_0 = arith.constant 0 : i32
    return %arg0, %c0_i32 : i32, i32
  }
  func.func @transform_1(%arg0: i32, %arg1: i32) -> (i32, i32) {
    %c0_i32 = arith.constant 0 : i32
    %c0_i32_0 = arith.constant 0 : i32
    %c0_i32_1 = arith.constant 0 : i32
    return %c0_i32, %c0_i32_0 : i32, i32
  }
  func.func @transform_2(%arg0: i32, %arg1: i32) -> (i32, i32) {
    %c0_i32 = arith.constant 0 : i32
    %c0_i32_0 = arith.constant 0 : i32
    %c0_i32_1 = arith.constant 0 : i32
    return %c0_i32, %c0_i32_0 : i32, i32
  }
  func.func @transform_3(%arg0: i32, %arg1: i32) -> (i32, i32) {
    %c0_i32 = arith.constant 0 : i32
    %c0_i32_0 = arith.constant 0 : i32
    return %c0_i32, %arg1 : i32, i32
  }
  func.func @transform_4(%arg0: i32, %arg1: i32) -> (i32, i32) {
    %c0_i32 = arith.constant 0 : i32
    %c0_i32_0 = arith.constant 0 : i32
    return %c0_i32, %arg1 : i32, i32
  }
  func.func @transform_5(%arg0: i32, %arg1: i32) -> (i32, i32) {
    %c0_i32 = arith.constant 0 : i32
    %c0_i32_0 = arith.constant 0 : i32
    return %c0_i32, %arg1 : i32, i32
  }
  func.func @transform_6(%arg0: i32, %arg1: i32) -> (i32, i32) {
    %c0_i32 = arith.constant 0 : i32
    return %arg0, %arg1 : i32, i32
  }
}

</mosaic_0001>

<bundles_post_ra>
// kernel: _resblock_forward.1
= control target key start
LH: loop header
LB: loop body
LE: loop exit
PB: predicated region body
PF: predicated region fallthrough
CT: control target
= control target key end

     0   :  { %s1853_s0 = inlined_call_operand.hbm [shape: f32[16,128], index: 0, kind: input, shape index: {}]   ;;  %s1854_s1 = inlined_call_operand.hbm [shape: f32[128,128], index: 1, kind: input, shape index: {}]   ;;  %s1855_s2 = inlined_call_operand.hbm [shape: f32[1,128], index: 2, kind: input, shape index: {}]   ;;  %s1856_s3 = inlined_call_operand.hbm [shape: f32[128,128], index: 3, kind: input, shape index: {}]   ;;  %s1857_s4 = inlined_call_operand.hbm [shape: f32[128,128], index: 4, kind: input, shape index: {}]   ;;  %s1858_s5 = inlined_call_operand.hbm [shape: f32[1,128], index: 5, kind: input, shape index: {}]   ;;  %s1859_s6 = inlined_call_operand.hbm [shape: f32[16,128], index: 6, kind: output, shape index: {}]  }
   0x1   :  { %1866 = sst [smem:[#allocation20_spill]] %s1854_s1 }
   0x2   :  { %11 = vsyncpa [#allocation4], 0 }
   0x3   :  { %13 = vsyncpa [#allocation4 + $0x1], 0 }
   0x4   :  { %14 = vsyncpa [#allocation7], 0 }
   0x5   :  { %15 = vsyncpa [#allocation10], 0 }
   0x6   :  { %16 = vsyncpa [#allocation13], 0 }
   0x7   :  { %17 = vsyncpa [#allocation5], 0 }
   0x8   :  { %19 = vsyncpa [#allocation5 + $0x1], 0  ;;  %s1490_s21 = smov 0   ;;  %s1492_s22 = smov 0  }
   0x9   :  { %s1494_s23 = smov 0   ;;  %s1496_s24 = smov 0  }
   0xa   :  { %s1498_s25 = smov 0   ;;  %s1500_s26 = smov 0  }
   0xb LB: > { %s1860_s27 = sadd.s32 4294967295, %s1441_s26   ;;  %p805_p0 = scmp.ge.s32.totalorder %s1441_s26, 1  ;;  %s1441_s26 = sphi %s1500_s26, %s25_s26   ;;  %s1437_s25 = sphi %s1498_s25, %s1889_s25   ;;  %s1433_s24 = sphi %s1496_s24, %s1888_s24   ;;  %s1429_s23 = sphi %s1494_s23, %s1887_s23   ;;  %s1425_s22 = sphi %s1492_s22, %s1886_s22   ;;  %s1421_s21 = sphi %s1490_s21, %s1885_s21  }
   0xc   : > { %p1524_p1 = scmp.eq.s32.totalorder %s1860_s27, 0  ;;  %p216_p2 = scmp.lt.s32.totalorder %s1441_s26, 3 }
   0xd   : > { %s1443_s30 = smov [#allocation6]   ;;  %s1444_s9 = smov [#allocation9]  }
   0xe   : > { %s1867_s28 = scalar_select %p1524_p1, 1, 0 }
   0xf   : > { %p1529_p3 = pnand %p805_p0, %p216_p2  ;;  %s228_s7 = sshll.u32 %s1443_s30, 4  ;;  %s1533_s7 = int_to_ptr.vmem [resolvable:$true] %s228_s7 }
  0x10   : > { %s254_s10 = sshll.u32 %s1444_s9, 4  ;;  %s1445_s11 = smov [#allocation8]   ;;  %s1544_s10 = int_to_ptr.vmem [resolvable:$true] %s254_s10 }
  0x11   : > { %s1868_s29 = scalar_select %p1529_p3, 1, 0 }
  0x12   : > { %p1083_p4 = pneg %p1529_p3  ;;  %s1546_s12 = sshll.u32 %s1445_s11, 4  ;;  %s243_s12 = int_to_ptr.vmem [resolvable:$true] %s1546_s12 }
  0x13   : > { %s1870_s1 = sld [smem:[#allocation20_spill]] }
  0x14   : > { %p1540_p6 = pnand %p1083_p4, %p1524_p1 }
  0x16   : > { %p1556_p8 = pneg %p1540_p6 }
  0x19   : > { %s1177_s15 = scalar_lea.hbm %s1870_s1, 2048 }
  0x1a   : > { %p1178_p7 = scmp.ne.s32.totalorder %s1870_s1, %s1177_s15  ;;  %p1184_p11 = scmp.lt.u32.totalorder %s1177_s15, %s1870_s1 }
  0x1c   : > { %p1180_p9 = pnand %p1556_p8, %p1178_p7 }
  0x1e   : > { %p1181_p10 = pneg %p1180_p9 }
  0x20   : > { %p1186_p12 = pnand %p1184_p11, %p1181_p10 }
  0x22   : > { %1189 = shalt.err (!%p1186_p12)
}
  0x23   : > { %s1190_s30 = scalar_lea.vmem %s1533_s7, 2048  ;;  %p1198_p4 = scmp.lt.s32.totalorder %s1533_s7, %s1533_s7 }
  0x24   : > { %p1191_p13 = scmp.ne.s32.totalorder %s1533_s7, %s1190_s30  ;;  %p1199_p5 = scmp.lt.s32.totalorder %s1190_s30, %s1190_s30 }
  0x26   : > { %p1193_p0 = pnand %p1191_p13, %p1556_p8  ;;  %p1200_p7 = por %p1199_p5, %p1198_p4 }
  0x28   : > { %p1194_p2 = pneg %p1193_p0 }
  0x2a   : > { %p1201_p9 = pnand %p1200_p7, %p1194_p2 }
  0x2c   : > { %1204 = shalt.err (!%p1201_p9)
}
  0x2d   : > { %s1864_s9 = smov 128   ;;  %s1447_s11 = smov 8  }
  0x2e   : > { %1086 = dma.hbm_to_vmem [thread:$0]  (!%p1540_p6), %s1870_s1, 2048, %s1533_s7, [#allocation7], %s1864_s9, %s1864_s9, %s1447_s11  }
  0x2f   : > { %s1205_s17 = scalar_lea.hbm %s1856_s3, 2048 }
  0x30   : > { %p1206_p5 = scmp.ne.s32.totalorder %s1856_s3, %s1205_s17  ;;  %p1212_p12 = scmp.lt.u32.totalorder %s1205_s17, %s1856_s3 }
  0x32   : > { %p1208_p10 = pnand %p1206_p5, %p1556_p8 }
  0x34   : > { %p1209_p11 = pneg %p1208_p10 }
  0x36   : > { %p1214_p13 = pnand %p1212_p12, %p1209_p11 }
  0x38   : > { %1217 = shalt.err (!%p1214_p13)
}
  0x39   : > { %s1218_s7 = scalar_lea.vmem %s1544_s10, 2048  ;;  %p1226_p7 = scmp.lt.s32.totalorder %s1544_s10, %s1544_s10 }
  0x3a   : > { %p1219_p0 = scmp.ne.s32.totalorder %s1544_s10, %s1218_s7  ;;  %p1227_p9 = scmp.lt.s32.totalorder %s1218_s7, %s1218_s7 }
  0x3c   : > { %p1221_p2 = pnand %p1219_p0, %p1556_p8  ;;  %p1228_p5 = por %p1227_p9, %p1226_p7 }
  0x3e   : > { %p1222_p4 = pneg %p1221_p2 }
  0x40   : > { %p1229_p10 = pnand %p1228_p5, %p1222_p4 }
  0x42   : > { %1232 = shalt.err (!%p1229_p10)
}
  0x43   : > { %1092 = dma.hbm_to_vmem [thread:$0]  (!%p1540_p6), %s1856_s3, 2048, %s1544_s10, [#allocation10], %s1864_s9, %s1864_s9, %s1447_s11  }
  0x44   : > { %s1233_s16 = scalar_lea.hbm %s1855_s2, 16 }
  0x45   : > { %p1234_p11 = scmp.ne.s32.totalorder %s1855_s2, %s1233_s16  ;;  %p1240_p0 = scmp.lt.u32.totalorder %s1233_s16, %s1855_s2 }
  0x47   : > { %p1236_p12 = pnand %p1234_p11, %p1556_p8 }
  0x49   : > { %p1237_p13 = pneg %p1236_p12 }
  0x4b   : > { %p1242_p2 = pnand %p1240_p0, %p1237_p13 }
  0x4d   : > { %1245 = shalt.err (!%p1242_p2)
}
  0x4e   : > { %s1246_s7 = scalar_lea.vmem %s243_s12, 16  ;;  %s1253_s10 = scalar_lea.vmem %s243_s12, 32 }
  0x4f   : > { %p1247_p4 = scmp.ne.s32.totalorder %s243_s12, %s1246_s7  ;;  %p1254_p5 = scmp.lt.s32.totalorder %s243_s12, %s243_s12 }
  0x50   : > { %p1255_p10 = scmp.lt.s32.totalorder %s1253_s10, %s1246_s7 }
  0x51   : > { %p1249_p7 = pnand %p1247_p4, %p1556_p8 }
  0x52   : > { %p1256_p3 = por %p1255_p10, %p1254_p5 }
  0x53   : > { %p1250_p9 = pneg %p1249_p7 }
  0x55   : > { %p1257_p1 = pnand %p1256_p3, %p1250_p9 }
  0x57   : > { %1260 = shalt.err (!%p1257_p1)
}
  0x58   : > { %1089 = dma.hbm_to_vmem [thread:$0]  (!%p1540_p6), %s1855_s2, 16, %s243_s12, [#allocation7]  }
  0x59   : > { %s1448_s14 = smov [#allocation11]   ;;  %s1449_s16 = smov [#allocation12]  }
  0x5a   : > { %s269_s15 = sshll.u32 %s1448_s14, 4  ;;  %s285_s17 = sshll.u32 %s1449_s16, 4  ;;  %s270_s15 = int_to_ptr.vmem [resolvable:$true] %s269_s15  ;;  %s286_s17 = int_to_ptr.vmem [resolvable:$true] %s285_s17 }
  0x5b   : > { %s1261_s30 = scalar_lea.hbm %s1857_s4, 2048 }
  0x5c   : > { %p1262_p1 = scmp.ne.s32.totalorder %s1857_s4, %s1261_s30  ;;  %p1268_p12 = scmp.lt.u32.totalorder %s1261_s30, %s1857_s4 }
  0x5e   : > { %p1264_p3 = pnand %p1262_p1, %p1556_p8 }
  0x60   : > { %p1265_p11 = pneg %p1264_p3 }
  0x62   : > { %p1270_p13 = pnand %p1268_p12, %p1265_p11 }
  0x64   : > { %1273 = shalt.err (!%p1270_p13)
}
  0x65   : > { %s1274_s12 = scalar_lea.vmem %s270_s15, 2048  ;;  %p1282_p7 = scmp.lt.s32.totalorder %s270_s15, %s270_s15 }
  0x66   : > { %p1275_p0 = scmp.ne.s32.totalorder %s270_s15, %s1274_s12  ;;  %p1283_p9 = scmp.lt.s32.totalorder %s1274_s12, %s1274_s12 }
  0x68   : > { %p1277_p2 = pnand %p1275_p0, %p1556_p8  ;;  %p1284_p5 = por %p1283_p9, %p1282_p7 }
  0x6a   : > { %p1278_p4 = pneg %p1277_p2 }
  0x6c   : > { %p1285_p10 = pnand %p1284_p5, %p1278_p4 }
  0x6e   : > { %1288 = shalt.err (!%p1285_p10)
}
  0x6f   : > { %s1872_s13 = smov 128   ;;  %s1289_s20 = scalar_lea.hbm %s1858_s5, 16 }
  0x70   : > { %1095 = dma.hbm_to_vmem [thread:$0]  (!%p1540_p6), %s1857_s4, 2048, %s270_s15, [#allocation10], %s1872_s13, %s1872_s13, %s1447_s11  }
  0x71   : > { %p1290_p1 = scmp.ne.s32.totalorder %s1858_s5, %s1289_s20  ;;  %p1296_p12 = scmp.lt.u32.totalorder %s1289_s20, %s1858_s5 }
  0x73   : > { %p1292_p3 = pnand %p1290_p1, %p1556_p8 }
  0x75   : > { %p1293_p11 = pneg %p1292_p3 }
  0x77   : > { %p1298_p13 = pnand %p1296_p12, %p1293_p11 }
  0x79   : > { %1301 = shalt.err (!%p1298_p13)
}
  0x7a   : > { %s1302_s12 = scalar_lea.vmem %s286_s17, 16  ;;  %s1309_s11 = scalar_lea.vmem %s286_s17, 32 }
  0x7b   : > { %p1303_p0 = scmp.ne.s32.totalorder %s286_s17, %s1302_s12  ;;  %p1310_p7 = scmp.lt.s32.totalorder %s286_s17, %s286_s17 }
  0x7c   : > { %p1311_p9 = scmp.lt.s32.totalorder %s1309_s11, %s1302_s12 }
  0x7d   : > { %p1305_p2 = pnand %p1303_p0, %p1556_p8 }
  0x7e   : > { %p1312_p5 = por %p1311_p9, %p1310_p7 }
  0x7f   : > { %p1306_p4 = pneg %p1305_p2 }
  0x81   : > { %p1313_p10 = pnand %p1312_p5, %p1306_p4 }
  0x83   : > { %1316 = shalt.err (!%p1313_p10)
}
  0x84   : > { %1098 = dma.hbm_to_vmem [thread:$0]  (!%p1540_p6), %s1858_s5, 16, %s286_s17, [#allocation13]  }
  0x85   : > { %s804_s18 = sadd.s32 4294967294, %s1441_s26   ;;  %s37_s9 = sadd.s32 1, %s1437_s25 }
  0x86   : > { %s44_s8 = sadd.s32 1, %s1429_s23  ;;  %p39_p8 = scmp.ge.s32.totalorder %s37_s9, 2 }
  0x87   : > { %p51_p1 = scmp.ne.s32.totalorder %s1429_s23, %s1425_s22  ;;  %p52_p3 = scmp.eq.s32.totalorder %s1441_s26, 0 }
  0x88   : > { %p57_p11 = scmp.ne.s32.totalorder %s1425_s22, %s1421_s21  ;;  %s1891_s9 = smov (%p39_p8, %s37_s9), 0 }
  0x89   : > { %p1674_p12 = por %p52_p3, %p51_p1  ;;  %p1874_p13 = scmp.ne.s32.totalorder %s1867_s28, 0 }
  0x8a   : > { %s41_s16 = ssub.s32 %s1437_s25, %s1891_s9  ;;  %s1876_s19 = sadd.s32 4294967295, %s1441_s26  }
  0x8b   : > { %p1680_p6 = por %p1874_p13, %p57_p11  ;;  %p203_p0 = scmp.eq.s32.totalorder %s1876_s19, 1 }
  0x8c   : > { %p42_p2 = scmp.eq.s32.totalorder %s41_s16, 0  ;;  %p209_p4 = scmp.eq.s32.totalorder %s804_s18, 1 }
  0x8d   : > { %p1688_p7 = por %p203_p0, %p51_p1  ;;  %p1112_p9 = scmp.lt.s32.totalorder %s1441_s26, 2 }
  0x8e   : > { %s1694_s30 = scalar_select %p42_p2, %s1429_s23, %s44_s8  }
  0x8f   : > { %s1877_s20 = scalar_select %p1688_p7, 1, 0 }
  0x90   : > { %p1696_p5 = por %p209_p4, %p57_p11  ;;  %s296_s10 = sand.u32 1, %s1429_s23  }
  0x91   : > { %s812_s27 = sshll.u32 %s296_s10, 3  ;;  %s813_s12 = sshll.u32 %s1437_s25, 7 }
  0x92   : > { %s1878_s7 = scalar_select %p1696_p5, 1, 0 }
  0x93   : > { %s1705_s13 = scalar_lea.hbm %s1853_s0, %s813_s12  ;;  %s300_s18 = scalar_lea.vmem [#allocation3], %s812_s27 }
  0x94   : > { %s307_s16 = sshll.u32 %s300_s18, 4  ;;  %p1711_p10 = pnand %p1112_p9, %p1674_p12  ;;  %s1707_s16 = int_to_ptr.vmem [resolvable:$true] %s307_s16 }
  0x95   : > { %s297_s19 = scalar_lea.sflag [#allocation4], %s296_s10  ;;  %s1317_s1 = scalar_lea.hbm %s1705_s13, 128 }
  0x96   : > { %p1318_p8 = scmp.ne.s32.totalorder %s1705_s13, %s1317_s1  ;;  %p1319_p1 = pneg %p1711_p10 }
  0x97   : > { %s1322_s11 = scalar_lea.hbm %s1853_s0, 256  ;;  %p1323_p12 = scmp.lt.u32.totalorder %s1705_s13, %s1853_s0 }
  0x98   : > { %p1320_p3 = pnand %p1319_p1, %p1318_p8  ;;  %p1324_p13 = scmp.lt.u32.totalorder %s1322_s11, %s1317_s1 }
  0x99   : > { %p1326_p2 = scmp.lt.u32.totalorder %s1317_s1, %s1705_s13 }
  0x9a   : > { %p1321_p11 = pneg %p1320_p3  ;;  %p1325_p0 = por %p1324_p13, %p1323_p12 }
  0x9c   : > { %p1327_p4 = por %p1326_p2, %p1325_p0 }
  0x9e   : > { %p1328_p9 = pnand %p1327_p4, %p1321_p11 }
  0xa0   : > { %1331 = shalt.err (!%p1328_p9)
}
  0xa1   : > { %s1332_s10 = scalar_lea.vmem %s1707_s16, 128  ;;  %s1450_s18 = smov [#allocation3]  }
  0xa2   : > { %p1333_p8 = scmp.ne.s32.totalorder %s1707_s16, %s1332_s10  ;;  %s1337_s27 = sshll.u32 %s1450_s18, 4  ;;  %s1338_s27 = int_to_ptr.vmem [resolvable:$false] %s1337_s27 }
  0xa3   : > { %s1339_s12 = scalar_lea.vmem %s1338_s27, 256  ;;  %p1340_p7 = scmp.lt.s32.totalorder %s1707_s16, %s1338_s27 }
  0xa4   : > { %p1335_p3 = pnand %p1333_p8, %p1319_p1  ;;  %p1341_p12 = scmp.lt.s32.totalorder %s1339_s12, %s1332_s10 }
  0xa6   : > { %p1336_p5 = pneg %p1335_p3  ;;  %p1342_p13 = por %p1341_p12, %p1340_p7 }
  0xa8   : > { %p1343_p0 = pnand %p1342_p13, %p1336_p5 }
  0xaa   : > { %1346 = shalt.err (!%p1343_p0)
}
  0xab   : > { %1102 = dma.hbm_to_vmem [thread:$0]  (!%p1711_p10), %s1705_s13, 128, %s1707_s16, %s297_s19  }
  0xac   : > { %p1880_p11 = scmp.ne.s32.totalorder %s1868_s29, 0 }
  0xad   : > { %s1743_s1 = sand.u32 (!%p1880_p11), 1, %s1425_s22  }
  0xae   : > { %316 = sbr.rel (%p1880_p11) target bundleno = 670 (0x29e), region = 44  ;;  %s815_s11 = sshll.u32 (!%p1880_p11), %s1743_s1, 3 }
  0xaf   : > { %s319_s14 = scalar_lea.sflag (!%p1880_p11), [#allocation4], %s1743_s1  ;;  %s1749_s15 = scalar_lea.vmem (!%p1880_p11), [#allocation3], %s815_s11 }
  0xb5   : > { %1400 = dma.done.wait (%p1680_p6), %s319_s14, 128  }
  0xb6   : > { %1402 = vsyncadd (%p1680_p6), %s319_s14, 4294967168  ;;  %p1881_p7 = scmp.ne.s32.totalorder %s1867_s28, 0 }
  0xb8   : > { %1404 = dma.done.wait (%p1881_p7), [#allocation7], 2064  }
  0xb9   : > { %1406 = vsyncadd (%p1881_p7), [#allocation7], 4294965232 }
  0xba   : > { %1408 = dma.done.wait (%p1881_p7), [#allocation10], 4096  }
  0xbb   : > { %1410 = vsyncadd (%p1881_p7), [#allocation10], 4294963200 }
  0xbc   : > { %1412 = dma.done.wait (%p1881_p7), [#allocation13], 16  }
  0xbd   : > { %1414 = vsyncadd (%p1881_p7), [#allocation13], 4294967280  ;;  %v1451_v0 = vmov 0.0|0.0   ;;  %vm1452_vm0 = vmmov 0   ;;  %v1453_v1 = vmov 0.0   ;;  %v376_v2 = vld [vmem:[#allocation6] sm:$0xff] }
  0xbe   : > { %984 = vmatprep.subr.bf16.mxu0 %v1451_v0  ;;  %911 = vmatprep.mubr.msk.f32.mxu0 %vm1452_vm0, %v1453_v1  ;;  %v377_v3 = vld [vmem:[#allocation6 + $0x8] sm:$0xff]  ;;  %v378_v4 = vld [vmem:[#allocation6 + $0x10] sm:$0xff]  ;;  %v379_v6 = vld [vmem:[#allocation6 + $0x18] sm:$0xff]  ;;  %s825_s28 = sshll.u32 %s1433_s24, 7  ;;  %s370_s29 = scalar_lea.vmem [#allocation14], %s815_s11 }
  0xbf   : > { %1008 = vmatprep.subr.bf16.mxu1 %v1451_v0  ;;  %946 = vmatprep.mubr.msk.f32.mxu1 %vm1452_vm0, %v1453_v1  ;;  %v985_v5 = vpack.c.bf16 %v377_v3, %v376_v2  ;;  %v988_v7 = vpack.c.bf16 %v379_v6, %v378_v4  ;;  %v380_v8 = vld [vmem:[#allocation6 + $0x20] sm:$0xff]  ;;  %v381_v9 = vld [vmem:[#allocation6 + $0x28] sm:$0xff]  ;;  %v474_v12 = vld [vmem:[#allocation11 + $0x10] sm:$0xff]  ;;  %s670_s17 = sshll.u32 %s370_s29, 4  ;;  %s1804_s8 = scalar_lea.hbm %s1859_s6, %s825_s28  ;;  %s1806_s17 = int_to_ptr.vmem [resolvable:$true] %s670_s17 }
  0xc0   : > { %v472_v10 = vld [vmem:[#allocation11] sm:$0xff]  ;;  %v473_v11 = vld [vmem:[#allocation11 + $0x8] sm:$0xff]  ;;  %v475_v13 = vld [vmem:[#allocation11 + $0x18] sm:$0xff]  ;;  %v991_v14 = vpack.c.bf16 %v381_v9, %v380_v8  ;;  %s656_s19 = scalar_lea.sflag [#allocation5], %s1743_s1  ;;  %s1347_s10 = scalar_lea.vmem %s1806_s17, 128 }
  0xc1   : > { %986 = vmatpush3.bf16.msra.mxu0 %v985_v5  ;;  %v1009_v15 = vpack.c.bf16 %v473_v11, %v472_v10  ;;  %v382_v16 = vld [vmem:[#allocation6 + $0x30] sm:$0xff]  ;;  %v383_v17 = vld [vmem:[#allocation6 + $0x38] sm:$0xff]  ;;  %v1012_v18 = vpack.c.bf16 %v475_v13, %v474_v12  ;;  %v476_v19 = vld [vmem:[#allocation11 + $0x20] sm:$0xff]  ;;  %p1348_p6 = scmp.ne.s32.totalorder %s1806_s17, %s1347_s10  ;;  %p1882_p5 = scmp.ne.s32.totalorder %s1877_s20, 0 }
  0xc2   : > { %987 = vmatprep.subr.bf16.mxu0 %v1451_v0  ;;  %v477_v20 = vld [vmem:[#allocation11 + $0x28] sm:$0xff]  ;;  %v994_v21 = vpack.c.bf16 %v383_v17, %v382_v16  ;;  %v384_v22 = vld [vmem:[#allocation6 + $0x40] sm:$0xff]  ;;  %v478_v25 = vld [vmem:[#allocation11 + $0x30] sm:$0xff]  ;;  %s1454_s24 = smov [#allocation14]  }
  0xc3   : > { %1010 = vmatpush3.bf16.msra.mxu1 %v1009_v15  ;;  %v385_v23 = vld [vmem:[#allocation6 + $0x48] sm:$0xff]  ;;  %v1015_v24 = vpack.c.bf16 %v477_v20, %v476_v19  ;;  %v479_v26 = vld [vmem:[#allocation11 + $0x38] sm:$0xff]  ;;  %v386_v28 = vld [vmem:[#allocation6 + $0x50] sm:$0xff]  ;;  %p1349_p10 = pnand %p1348_p6, %p1882_p5  ;;  %s1351_s18 = sshll.u32 %s1454_s24, 4  ;;  %s1352_s18 = int_to_ptr.vmem [resolvable:$false] %s1351_s18 }
  0xc4   : > { %1011 = vmatprep.subr.bf16.mxu1 %v1451_v0  ;;  %v997_v27 = vpack.c.bf16 %v385_v23, %v384_v22  ;;  %v387_v29 = vld [vmem:[#allocation6 + $0x58] sm:$0xff]  ;;  %v1018_v30 = vpack.c.bf16 %v479_v26, %v478_v25  ;;  %v480_v31 = vld [vmem:[#allocation11 + $0x40] sm:$0xff]  ;;  %v481_v32 = vld [vmem:[#allocation11 + $0x48] sm:$0xff]  ;;  %s1353_s27 = scalar_lea.vmem %s1352_s18, 256  ;;  %p1354_p2 = scmp.lt.s32.totalorder %s1806_s17, %s1352_s18 }
  0xc5   : > { %989 = vmatpush3.bf16.msra.mxu0 %v988_v7  ;;  %v1000_v33 = vpack.c.bf16 %v387_v29, %v386_v28  ;;  %v388_v34 = vld [vmem:[#allocation6 + $0x60] sm:$0xff]  ;;  %v389_v35 = vld [vmem:[#allocation6 + $0x68] sm:$0xff]  ;;  %v1021_v36 = vpack.c.bf16 %v481_v32, %v480_v31  ;;  %v482_v37 = vld [vmem:[#allocation11 + $0x50] sm:$0xff]  ;;  %p1350_p1 = pneg %p1349_p10  ;;  %p1355_p4 = scmp.lt.s32.totalorder %s1353_s27, %s1347_s10 }
  0xc6   : > { %990 = vmatprep.subr.bf16.mxu0 %v1451_v0  ;;  %v483_v38 = vld [vmem:[#allocation11 + $0x58] sm:$0xff]  ;;  %v1003_v39 = vpack.c.bf16 %v389_v35, %v388_v34  ;;  %v390_v40 = vld [vmem:[#allocation6 + $0x70] sm:$0xff]  ;;  %v484_v43 = vld [vmem:[#allocation11 + $0x60] sm:$0xff] }
  0xc7   : > { %1013 = vmatpush3.bf16.msra.mxu1 %v1012_v18  ;;  %v391_v41 = vld [vmem:[#allocation6 + $0x78] sm:$0xff]  ;;  %v1024_v42 = vpack.c.bf16 %v483_v38, %v482_v37  ;;  %v485_v44 = vld [vmem:[#allocation11 + $0x68] sm:$0xff]  ;;  %v559_v51 = vld [vmem:[#allocation9] sm:$0xff]  ;;  %p1356_p9 = por %p1355_p4, %p1354_p2 }
  0xc8   : > { %1014 = vmatprep.subr.bf16.mxu1 %v1451_v0  ;;  %v1006_v45 = vpack.c.bf16 %v391_v41, %v390_v40  ;;  %v1027_v46 = vpack.c.bf16 %v485_v44, %v484_v43  ;;  %v486_v47 = vld [vmem:[#allocation11 + $0x70] sm:$0xff]  ;;  %v487_v48 = vld [vmem:[#allocation11 + $0x78] sm:$0xff]  ;;  %v560_v52 = vld [vmem:[#allocation9 + $0x8] sm:$0xff] }
  0xc9   : > { %992 = vmatpush3.bf16.msra.mxu0 %v991_v14  ;;  %v375_v49 = vld [vmem:[%s1749_s15] sm:$0xff]  ;;  %v1030_v50 = vpack.c.bf16 %v487_v48, %v486_v47  ;;  %v1033_v53 = vpack.c.bf16 %v560_v52, %v559_v51  ;;  %v563_v57 = vld [vmem:[#allocation9 + $0x20] sm:$0xff]  ;;  %v822_v12 = vld [vmem:[#allocation8] ss:$0 sm:$0xff]  ;;  %p1357_p8 = pnand %p1356_p9, %p1350_p1 }
  0xca   : > { %993 = vmatprep.subr.bf16.mxu0 %v1451_v0  ;;  %v561_v54 = vld [vmem:[#allocation9 + $0x10] sm:$0xff]  ;;  %v562_v55 = vld [vmem:[#allocation9 + $0x18] sm:$0xff]  ;;  %v564_v58 = vld [vmem:[#allocation9 + $0x28] sm:$0xff] }
  0xcb   : > { %1016 = vmatpush3.bf16.msra.mxu1 %v1015_v24  ;;  %v1036_v56 = vpack.c.bf16 %v562_v55, %v561_v54  ;;  %v1039_v59 = vpack.c.bf16 %v564_v58, %v563_v57  ;;  %v565_v60 = vld [vmem:[#allocation9 + $0x30] sm:$0xff]  ;;  %v566_v61 = vld [vmem:[#allocation9 + $0x38] sm:$0xff]  ;;  %v567_v63 = vld [vmem:[#allocation9 + $0x40] sm:$0xff] }
  0xcc   : > { %1017 = vmatprep.subr.bf16.mxu1 %v1451_v0  ;;  %v1042_v62 = vpack.c.bf16 %v566_v61, %v565_v60  ;;  %v568_v2 = vld [vmem:[#allocation9 + $0x48] sm:$0xff]  ;;  %v570_v4 = vld [vmem:[#allocation9 + $0x58] sm:$0xff]  ;;  %v571_v6 = vld [vmem:[#allocation9 + $0x60] sm:$0xff] }
  0xcd   : > { %995 = vmatpush3.bf16.msra.mxu0 %v994_v21  ;;  %v1045_v3 = vpack.c.bf16 %v568_v2, %v567_v63  ;;  %v572_v7 = vld [vmem:[#allocation9 + $0x68] sm:$0xff]  ;;  %v573_v9 = vld [vmem:[#allocation9 + $0x70] sm:$0xff]  ;;  %v574_v10 = vld [vmem:[#allocation9 + $0x78] sm:$0xff] }
  0xce   : > { %996 = vmatprep.subr.bf16.mxu0 %v1451_v0  ;;  %v1051_v8 = vpack.c.bf16 %v572_v7, %v571_v6  ;;  %v1054_v11 = vpack.c.bf16 %v574_v10, %v573_v9  ;;  %v823_v17 = vld [vmem:[#allocation12] ss:$0 sm:$0xff] }
  0xcf   : > { %1019 = vmatpush3.bf16.msra.mxu1 %v1018_v30 }
  0xd0   : > { %1020 = vmatprep.subr.bf16.mxu1 %v1451_v0 }
  0xd1   : > { %998 = vmatpush3.bf16.msra.mxu0 %v997_v27 }
  0xd2   : > { %999 = vmatprep.subr.bf16.mxu0 %v1451_v0 }
  0xd3   : > { %1022 = vmatpush3.bf16.msra.mxu1 %v1021_v36 }
  0xd4   : > { %1023 = vmatprep.subr.bf16.mxu1 %v1451_v0 }
  0xd5   : > { %1001 = vmatpush3.bf16.msra.mxu0 %v1000_v33 }
  0xd6   : > { %1002 = vmatprep.subr.bf16.mxu0 %v1451_v0 }
  0xd7   : > { %1025 = vmatpush3.bf16.msra.mxu1 %v1024_v42 }
  0xd8   : > { %1026 = vmatprep.subr.bf16.mxu1 %v1451_v0 }
  0xd9   : > { %1004 = vmatpush3.bf16.msra.mxu0 %v1003_v39 }
  0xda   : > { %1005 = vmatprep.subr.bf16.mxu0 %v1451_v0 }
  0xdb   : > { %1028 = vmatpush3.bf16.msra.mxu1 %v1027_v46 }
  0xdc   : > { %1029 = vmatprep.subr.bf16.mxu1 %v1451_v0 }
  0xdd   : > { %1007 = vmatpush3.bf16.msra.mxu0 %v1006_v45 }
  0xdf   : > { %1031 = vmatpush3.bf16.msra.mxu1 %v1030_v50 }
  0xe0   : > { %912 = vmatmul.mubr.f32.vlgmr.msra.gmra.mrb[0].mxu0 %v375_v49  ;;  %1032 = vmatprep.subr.bf16.mxu1 %v1451_v0 }
  0xe2   : > { %947 = vmatmul.mubr.f32.vlgmr.msra.gmra.mrb[0].mxu1 %v375_v49 }
  0xe3   : > { %1034 = vmatpush3.bf16.msra.mxu1 %v1033_v53  ;;  %981 = vmatprep.mubr.msk.f32.mxu1 %vm1452_vm0, %v1453_v1  ;;  %v569_v1 = vld [vmem:[#allocation9 + $0x50] sm:$0xff] }
  0xe4   : > { %1035 = vmatprep.subr.bf16.mxu1 %v1451_v0  ;;  %v1048_v5 = vpack.c.bf16 %v570_v4, %v569_v1 }
  0xe7   : > { %1037 = vmatpush3.bf16.msra.mxu1 %v1036_v56 }
  0xe8   : > { %1038 = vmatprep.subr.bf16.mxu1 %v1451_v0 }
  0xeb   : > { %1040 = vmatpush3.bf16.msra.mxu1 %v1039_v59 }
  0xec   : > { %1041 = vmatprep.subr.bf16.mxu1 %v1451_v0 }
  0xef   : > { %1043 = vmatpush3.bf16.msra.mxu1 %v1042_v62 }
  0xf0   : > { %1044 = vmatprep.subr.bf16.mxu1 %v1451_v0 }
  0xf3   : > { %1046 = vmatpush3.bf16.msra.mxu1 %v1045_v3 }
  0xf4   : > { %1047 = vmatprep.subr.bf16.mxu1 %v1451_v0 }
  0xf7   : > { %1049 = vmatpush3.bf16.msra.mxu1 %v1048_v5 }
  0xf8   : > { %1050 = vmatprep.subr.bf16.mxu1 %v1451_v0 }
  0xfb   : > { %1052 = vmatpush3.bf16.msra.mxu1 %v1051_v8 }
  0xfc   : > { %1053 = vmatprep.subr.bf16.mxu1 %v1451_v0 }
  0xff   : > { %1055 = vmatpush3.bf16.msra.mxu1 %v1054_v11 }
 0x1b3   : > { %v465_v13 = vpop.f32.mrb[0].mxu0 }
 0x1b4   : > { %v466_v14 = vadd.f32 %v822_v12, %v465_v13  ;;  %v913_v15 = vpop.f32.mrb[1].mxu0 }
 0x1b6   : > { %v469_v16 = vmax.f32 %v466_v14, 0.0 }
 0x1b8   : > { %982 = vmatmul.mubr.f32.vlgmr.msra.gmra.mrb[0].mxu1 %v469_v16 }
 0x28b   : > { %v648_v18 = vpop.f32.mrb[0].mxu1 }
 0x28c   : > { %v649_v19 = vadd.f32 %v823_v17, %v648_v18  ;;  %v983_v0 = vpop.f32.mrb[1].mxu1 }
 0x28e   : > { %v653_v20 = vmax.f32 %v649_v19, 0.0 }
 0x290   : > { %654 = vst [vmem:[%s370_s29] sm:$0xff] %v653_v20 }
 0x291   : > { %1360 = shalt.err (!%p1357_p8)
}
 0x292   : > { %s1361_s12 = scalar_lea.hbm %s1804_s8, 128  ;;  %s1365_s14 = scalar_lea.hbm %s1859_s6, 256 }
 0x293   : > { %p1362_p3 = scmp.ne.s32.totalorder %s1804_s8, %s1361_s12  ;;  %p1366_p0 = scmp.lt.u32.totalorder %s1804_s8, %s1859_s6 }
 0x294   : > { %p1367_p11 = scmp.lt.u32.totalorder %s1365_s14, %s1361_s12  ;;  %p1369_p6 = scmp.lt.u32.totalorder %s1361_s12, %s1804_s8 }
 0x295   : > { %p1363_p12 = pnand %p1362_p3, %p1882_p5 }
 0x296   : > { %p1368_p7 = por %p1367_p11, %p1366_p0 }
 0x297   : > { %p1364_p13 = pneg %p1363_p12 }
 0x298   : > { %p1370_p10 = por %p1369_p6, %p1368_p7 }
 0x29a   : > { %p1371_p1 = pnand %p1370_p10, %p1364_p13 }
 0x29c   : > { %1374 = shalt.err (!%p1371_p1)
}
 0x29d   : > { %1081 = dma.vmem_to_hbm [thread:$0]  (%p1882_p5), %s1806_s17, 128, %s1804_s8, %s656_s19  }
 0x29e PF: > { %s682_s29 = sand.u32 1, %s1421_s21   ;;  %p1883_p2 = scmp.ne.s32.totalorder %s1878_s7, 0 }
 0x29f   : > { %p1884_p4 = scmp.ge.s32.totalorder %s1441_s26, 2  ;;  %s683_s13 = scalar_lea.sflag [#allocation5], %s682_s29 }
 0x2a1   : > { %p1104_p9 = pnand %p1884_p4, %p1883_p2 }
 0x2a3   : > { %1416 = dma.done.wait (!%p1104_p9), %s683_s13, 128  }
 0x2a4   : > { %1418 = vsyncadd (!%p1104_p9), %s683_s13, 4294967168  ;;  %s25_s26 = sadd.s32 1, %s1441_s26   ;;  %s1885_s21 = smov %s1425_s22 }
 0x2a5   : > { %p22_p8 = scmp.ge.s32.totalorder %s25_s26, 4   ;;  %s1886_s22 = smov %s1429_s23 }
 0x2a6   : > { %s1887_s23 = smov %s1694_s30  ;;  %s1888_s24 = smov %s1437_s25 }
 0x2a7   : > { %s1889_s25 = smov %s1891_s9  ;;  %24 = sbr.rel (!%p22_p8) target bundleno = 11 (0xb), region = 116 }
 0x2ae   :  { %688 = vsyncpa [#allocation4], 1 }
 0x2af   :  { %690 = vsyncpa [#allocation4 + $0x1], 1 }
 0x2b0   :  { %691 = vsyncpa [#allocation7], 1 }
 0x2b1   :  { %692 = vsyncpa [#allocation10], 1 }
 0x2b2   :  { %693 = vsyncpa [#allocation13], 1 }
 0x2b3   :  { %694 = vsyncpa [#allocation5], 1 }
 0x2b4   :  { %696 = vsyncpa [#allocation5 + $0x1], 1 }

// kernel: _resblock_forward.1
= control target key start
LH: loop header
LB: loop body
LE: loop exit
PB: predicated region body
PF: predicated region fallthrough
CT: control target
= control target key end

     0   :  { %s1853_s0 = inlined_call_operand.hbm [shape: f32[16,128], index: 0, kind: input, shape index: {}]   ;;  %s1854_s1 = inlined_call_operand.hbm [shape: f32[128,128], index: 1, kind: input, shape index: {}]   ;;  %s1855_s2 = inlined_call_operand.hbm [shape: f32[1,128], index: 2, kind: input, shape index: {}]   ;;  %s1856_s3 = inlined_call_operand.hbm [shape: f32[128,128], index: 3, kind: input, shape index: {}]   ;;  %s1857_s4 = inlined_call_operand.hbm [shape: f32[128,128], index: 4, kind: input, shape index: {}]   ;;  %s1858_s5 = inlined_call_operand.hbm [shape: f32[1,128], index: 5, kind: input, shape index: {}]   ;;  %s1859_s6 = inlined_call_operand.hbm [shape: f32[16,128], index: 6, kind: output, shape index: {}]  }
   0x1   :  { %1866 = sst [smem:[#allocation20_spill]] %s1854_s1 }
   0x2   :  { %11 = vsyncpa [#allocation4], 0 }
   0x3   :  { %13 = vsyncpa [#allocation4 + $0x1], 0 }
   0x4   :  { %14 = vsyncpa [#allocation7], 0 }
   0x5   :  { %15 = vsyncpa [#allocation10], 0 }
   0x6   :  { %16 = vsyncpa [#allocation13], 0 }
   0x7   :  { %17 = vsyncpa [#allocation5], 0 }
   0x8   :  { %19 = vsyncpa [#allocation5 + $0x1], 0  ;;  %s1490_s21 = smov 0   ;;  %s1492_s22 = smov 0  }
   0x9   :  { %s1494_s23 = smov 0   ;;  %s1496_s24 = smov 0  }
   0xa   :  { %s1498_s25 = smov 0   ;;  %s1500_s26 = smov 0  }
   0xb LB: > { %s1860_s27 = sadd.s32 4294967295, %s1441_s26   ;;  %p805_p0 = scmp.ge.s32.totalorder %s1441_s26, 1  ;;  %s1441_s26 = sphi %s1500_s26, %s25_s26   ;;  %s1437_s25 = sphi %s1498_s25, %s1889_s25   ;;  %s1433_s24 = sphi %s1496_s24, %s1888_s24   ;;  %s1429_s23 = sphi %s1494_s23, %s1887_s23   ;;  %s1425_s22 = sphi %s1492_s22, %s1886_s22   ;;  %s1421_s21 = sphi %s1490_s21, %s1885_s21  }
   0xc   : > { %p1524_p1 = scmp.eq.s32.totalorder %s1860_s27, 0  ;;  %p216_p2 = scmp.lt.s32.totalorder %s1441_s26, 3 }
   0xd   : > { %s1443_s30 = smov [#allocation6]   ;;  %s1444_s9 = smov [#allocation9]  }
   0xe   : > { %s1867_s28 = scalar_select %p1524_p1, 1, 0 }
   0xf   : > { %p1529_p3 = pnand %p805_p0, %p216_p2  ;;  %s228_s7 = sshll.u32 %s1443_s30, 4  ;;  %s1533_s7 = int_to_ptr.vmem [resolvable:$true] %s228_s7 }
  0x10   : > { %s254_s10 = sshll.u32 %s1444_s9, 4  ;;  %s1445_s11 = smov [#allocation8]   ;;  %s1544_s10 = int_to_ptr.vmem [resolvable:$true] %s254_s10 }
  0x11   : > { %s1868_s29 = scalar_select %p1529_p3, 1, 0 }
  0x12   : > { %p1083_p4 = pneg %p1529_p3  ;;  %s1546_s12 = sshll.u32 %s1445_s11, 4  ;;  %s243_s12 = int_to_ptr.vmem [resolvable:$true] %s1546_s12 }
  0x13   : > { %s1870_s1 = sld [smem:[#allocation20_spill]] }
  0x14   : > { %p1540_p6 = pnand %p1083_p4, %p1524_p1 }
  0x16   : > { %p1556_p8 = pneg %p1540_p6 }
  0x19   : > { %s1177_s15 = scalar_lea.hbm %s1870_s1, 2048 }
  0x1a   : > { %p1178_p7 = scmp.ne.s32.totalorder %s1870_s1, %s1177_s15  ;;  %p1184_p11 = scmp.lt.u32.totalorder %s1177_s15, %s1870_s1 }
  0x1c   : > { %p1180_p9 = pnand %p1556_p8, %p1178_p7 }
  0x1e   : > { %p1181_p10 = pneg %p1180_p9 }
  0x20   : > { %p1186_p12 = pnand %p1184_p11, %p1181_p10 }
  0x22   : > { %1189 = shalt.err (!%p1186_p12)
}
  0x23   : > { %s1190_s30 = scalar_lea.vmem %s1533_s7, 2048  ;;  %p1198_p4 = scmp.lt.s32.totalorder %s1533_s7, %s1533_s7 }
  0x24   : > { %p1191_p13 = scmp.ne.s32.totalorder %s1533_s7, %s1190_s30  ;;  %p1199_p5 = scmp.lt.s32.totalorder %s1190_s30, %s1190_s30 }
  0x26   : > { %p1193_p0 = pnand %p1191_p13, %p1556_p8  ;;  %p1200_p7 = por %p1199_p5, %p1198_p4 }
  0x28   : > { %p1194_p2 = pneg %p1193_p0 }
  0x2a   : > { %p1201_p9 = pnand %p1200_p7, %p1194_p2 }
  0x2c   : > { %1204 = shalt.err (!%p1201_p9)
}
  0x2d   : > { %s1864_s9 = smov 128   ;;  %s1447_s11 = smov 8  }
  0x2e   : > { %1086 = dma.hbm_to_vmem [thread:$0]  (!%p1540_p6), %s1870_s1, 2048, %s1533_s7, [#allocation7], %s1864_s9, %s1864_s9, %s1447_s11  }
  0x2f   : > { %s1205_s17 = scalar_lea.hbm %s1856_s3, 2048 }
  0x30   : > { %p1206_p5 = scmp.ne.s32.totalorder %s1856_s3, %s1205_s17  ;;  %p1212_p12 = scmp.lt.u32.totalorder %s1205_s17, %s1856_s3 }
  0x32   : > { %p1208_p10 = pnand %p1206_p5, %p1556_p8 }
  0x34   : > { %p1209_p11 = pneg %p1208_p10 }
  0x36   : > { %p1214_p13 = pnand %p1212_p12, %p1209_p11 }
  0x38   : > { %1217 = shalt.err (!%p1214_p13)
}
  0x39   : > { %s1218_s7 = scalar_lea.vmem %s1544_s10, 2048  ;;  %p1226_p7 = scmp.lt.s32.totalorder %s1544_s10, %s1544_s10 }
  0x3a   : > { %p1219_p0 = scmp.ne.s32.totalorder %s1544_s10, %s1218_s7  ;;  %p1227_p9 = scmp.lt.s32.totalorder %s1218_s7, %s1218_s7 }
  0x3c   : > { %p1221_p2 = pnand %p1219_p0, %p1556_p8  ;;  %p1228_p5 = por %p1227_p9, %p1226_p7 }
  0x3e   : > { %p1222_p4 = pneg %p1221_p2 }
  0x40   : > { %p1229_p10 = pnand %p1228_p5, %p1222_p4 }
  0x42   : > { %1232 = shalt.err (!%p1229_p10)
}
  0x43   : > { %1092 = dma.hbm_to_vmem [thread:$0]  (!%p1540_p6), %s1856_s3, 2048, %s1544_s10, [#allocation10], %s1864_s9, %s1864_s9, %s1447_s11  }
  0x44   : > { %s1233_s16 = scalar_lea.hbm %s1855_s2, 16 }
  0x45   : > { %p1234_p11 = scmp.ne.s32.totalorder %s1855_s2, %s1233_s16  ;;  %p1240_p0 = scmp.lt.u32.totalorder %s1233_s16, %s1855_s2 }
  0x47   : > { %p1236_p12 = pnand %p1234_p11, %p1556_p8 }
  0x49   : > { %p1237_p13 = pneg %p1236_p12 }
  0x4b   : > { %p1242_p2 = pnand %p1240_p0, %p1237_p13 }
  0x4d   : > { %1245 = shalt.err (!%p1242_p2)
}
  0x4e   : > { %s1246_s7 = scalar_lea.vmem %s243_s12, 16  ;;  %s1253_s10 = scalar_lea.vmem %s243_s12, 32 }
  0x4f   : > { %p1247_p4 = scmp.ne.s32.totalorder %s243_s12, %s1246_s7  ;;  %p1254_p5 = scmp.lt.s32.totalorder %s243_s12, %s243_s12 }
  0x50   : > { %p1255_p10 = scmp.lt.s32.totalorder %s1253_s10, %s1246_s7 }
  0x51   : > { %p1249_p7 = pnand %p1247_p4, %p1556_p8 }
  0x52   : > { %p1256_p3 = por %p1255_p10, %p1254_p5 }
  0x53   : > { %p1250_p9 = pneg %p1249_p7 }
  0x55   : > { %p1257_p1 = pnand %p1256_p3, %p1250_p9 }
  0x57   : > { %1260 = shalt.err (!%p1257_p1)
}
  0x58   : > { %1089 = dma.hbm_to_vmem [thread:$0]  (!%p1540_p6), %s1855_s2, 16, %s243_s12, [#allocation7]  }
  0x59   : > { %s1448_s14 = smov [#allocation11]   ;;  %s1449_s16 = smov [#allocation12]  }
  0x5a   : > { %s269_s15 = sshll.u32 %s1448_s14, 4  ;;  %s285_s17 = sshll.u32 %s1449_s16, 4  ;;  %s270_s15 = int_to_ptr.vmem [resolvable:$true] %s269_s15  ;;  %s286_s17 = int_to_ptr.vmem [resolvable:$true] %s285_s17 }
  0x5b   : > { %s1261_s30 = scalar_lea.hbm %s1857_s4, 2048 }
  0x5c   : > { %p1262_p1 = scmp.ne.s32.totalorder %s1857_s4, %s1261_s30  ;;  %p1268_p12 = scmp.lt.u32.totalorder %s1261_s30, %s1857_s4 }
  0x5e   : > { %p1264_p3 = pnand %p1262_p1, %p1556_p8 }
  0x60   : > { %p1265_p11 = pneg %p1264_p3 }
  0x62   : > { %p1270_p13 = pnand %p1268_p12, %p1265_p11 }
  0x64   : > { %1273 = shalt.err (!%p1270_p13)
}
  0x65   : > { %s1274_s12 = scalar_lea.vmem %s270_s15, 2048  ;;  %p1282_p7 = scmp.lt.s32.totalorder %s270_s15, %s270_s15 }
  0x66   : > { %p1275_p0 = scmp.ne.s32.totalorder %s270_s15, %s1274_s12  ;;  %p1283_p9 = scmp.lt.s32.totalorder %s1274_s12, %s1274_s12 }
  0x68   : > { %p1277_p2 = pnand %p1275_p0, %p1556_p8  ;;  %p1284_p5 = por %p1283_p9, %p1282_p7 }
  0x6a   : > { %p1278_p4 = pneg %p1277_p2 }
  0x6c   : > { %p1285_p10 = pnand %p1284_p5, %p1278_p4 }
  0x6e   : > { %1288 = shalt.err (!%p1285_p10)
}
  0x6f   : > { %s1872_s13 = smov 128   ;;  %s1289_s20 = scalar_lea.hbm %s1858_s5, 16 }
  0x70   : > { %1095 = dma.hbm_to_vmem [thread:$0]  (!%p1540_p6), %s1857_s4, 2048, %s270_s15, [#allocation10], %s1872_s13, %s1872_s13, %s1447_s11  }
  0x71   : > { %p1290_p1 = scmp.ne.s32.totalorder %s1858_s5, %s1289_s20  ;;  %p1296_p12 = scmp.lt.u32.totalorder %s1289_s20, %s1858_s5 }
  0x73   : > { %p1292_p3 = pnand %p1290_p1, %p1556_p8 }
  0x75   : > { %p1293_p11 = pneg %p1292_p3 }
  0x77   : > { %p1298_p13 = pnand %p1296_p12, %p1293_p11 }
  0x79   : > { %1301 = shalt.err (!%p1298_p13)
}
  0x7a   : > { %s1302_s12 = scalar_lea.vmem %s286_s17, 16  ;;  %s1309_s11 = scalar_lea.vmem %s286_s17, 32 }
  0x7b   : > { %p1303_p0 = scmp.ne.s32.totalorder %s286_s17, %s1302_s12  ;;  %p1310_p7 = scmp.lt.s32.totalorder %s286_s17, %s286_s17 }
  0x7c   : > { %p1311_p9 = scmp.lt.s32.totalorder %s1309_s11, %s1302_s12 }
  0x7d   : > { %p1305_p2 = pnand %p1303_p0, %p1556_p8 }
  0x7e   : > { %p1312_p5 = por %p1311_p9, %p1310_p7 }
  0x7f   : > { %p1306_p4 = pneg %p1305_p2 }
  0x81   : > { %p1313_p10 = pnand %p1312_p5, %p1306_p4 }
  0x83   : > { %1316 = shalt.err (!%p1313_p10)
}
  0x84   : > { %1098 = dma.hbm_to_vmem [thread:$0]  (!%p1540_p6), %s1858_s5, 16, %s286_s17, [#allocation13]  }
  0x85   : > { %s804_s18 = sadd.s32 4294967294, %s1441_s26   ;;  %s37_s9 = sadd.s32 1, %s1437_s25 }
  0x86   : > { %s44_s8 = sadd.s32 1, %s1429_s23  ;;  %p39_p8 = scmp.ge.s32.totalorder %s37_s9, 2 }
  0x87   : > { %p51_p1 = scmp.ne.s32.totalorder %s1429_s23, %s1425_s22  ;;  %p52_p3 = scmp.eq.s32.totalorder %s1441_s26, 0 }
  0x88   : > { %p57_p11 = scmp.ne.s32.totalorder %s1425_s22, %s1421_s21  ;;  %s1891_s9 = smov (%p39_p8, %s37_s9), 0 }
  0x89   : > { %p1674_p12 = por %p52_p3, %p51_p1  ;;  %p1874_p13 = scmp.ne.s32.totalorder %s1867_s28, 0 }
  0x8a   : > { %s41_s16 = ssub.s32 %s1437_s25, %s1891_s9  ;;  %s1876_s19 = sadd.s32 4294967295, %s1441_s26  }
  0x8b   : > { %p1680_p6 = por %p1874_p13, %p57_p11  ;;  %p203_p0 = scmp.eq.s32.totalorder %s1876_s19, 1 }
  0x8c   : > { %p42_p2 = scmp.eq.s32.totalorder %s41_s16, 0  ;;  %p209_p4 = scmp.eq.s32.totalorder %s804_s18, 1 }
  0x8d   : > { %p1688_p7 = por %p203_p0, %p51_p1  ;;  %p1112_p9 = scmp.lt.s32.totalorder %s1441_s26, 2 }
  0x8e   : > { %s1694_s30 = scalar_select %p42_p2, %s1429_s23, %s44_s8  }
  0x8f   : > { %s1877_s20 = scalar_select %p1688_p7, 1, 0 }
  0x90   : > { %p1696_p5 = por %p209_p4, %p57_p11  ;;  %s296_s10 = sand.u32 1, %s1429_s23  }
  0x91   : > { %s812_s27 = sshll.u32 %s296_s10, 3  ;;  %s813_s12 = sshll.u32 %s1437_s25, 7 }
  0x92   : > { %s1878_s7 = scalar_select %p1696_p5, 1, 0 }
  0x93   : > { %s1705_s13 = scalar_lea.hbm %s1853_s0, %s813_s12  ;;  %s300_s18 = scalar_lea.vmem [#allocation3], %s812_s27 }
  0x94   : > { %s307_s16 = sshll.u32 %s300_s18, 4  ;;  %p1711_p10 = pnand %p1112_p9, %p1674_p12  ;;  %s1707_s16 = int_to_ptr.vmem [resolvable:$true] %s307_s16 }
  0x95   : > { %s297_s19 = scalar_lea.sflag [#allocation4], %s296_s10  ;;  %s1317_s1 = scalar_lea.hbm %s1705_s13, 128 }
  0x96   : > { %p1318_p8 = scmp.ne.s32.totalorder %s1705_s13, %s1317_s1  ;;  %p1319_p1 = pneg %p1711_p10 }
  0x97   : > { %s1322_s11 = scalar_lea.hbm %s1853_s0, 256  ;;  %p1323_p12 = scmp.lt.u32.totalorder %s1705_s13, %s1853_s0 }
  0x98   : > { %p1320_p3 = pnand %p1319_p1, %p1318_p8  ;;  %p1324_p13 = scmp.lt.u32.totalorder %s1322_s11, %s1317_s1 }
  0x99   : > { %p1326_p2 = scmp.lt.u32.totalorder %s1317_s1, %s1705_s13 }
  0x9a   : > { %p1321_p11 = pneg %p1320_p3  ;;  %p1325_p0 = por %p1324_p13, %p1323_p12 }
  0x9c   : > { %p1327_p4 = por %p1326_p2, %p1325_p0 }
  0x9e   : > { %p1328_p9 = pnand %p1327_p4, %p1321_p11 }
  0xa0   : > { %1331 = shalt.err (!%p1328_p9)
}
  0xa1   : > { %s1332_s10 = scalar_lea.vmem %s1707_s16, 128  ;;  %s1450_s18 = smov [#allocation3]  }
  0xa2   : > { %p1333_p8 = scmp.ne.s32.totalorder %s1707_s16, %s1332_s10  ;;  %s1337_s27 = sshll.u32 %s1450_s18, 4  ;;  %s1338_s27 = int_to_ptr.vmem [resolvable:$false] %s1337_s27 }
  0xa3   : > { %s1339_s12 = scalar_lea.vmem %s1338_s27, 256  ;;  %p1340_p7 = scmp.lt.s32.totalorder %s1707_s16, %s1338_s27 }
  0xa4   : > { %p1335_p3 = pnand %p1333_p8, %p1319_p1  ;;  %p1341_p12 = scmp.lt.s32.totalorder %s1339_s12, %s1332_s10 }
  0xa6   : > { %p1336_p5 = pneg %p1335_p3  ;;  %p1342_p13 = por %p1341_p12, %p1340_p7 }
  0xa8   : > { %p1343_p0 = pnand %p1342_p13, %p1336_p5 }
  0xaa   : > { %1346 = shalt.err (!%p1343_p0)
}
  0xab   : > { %1102 = dma.hbm_to_vmem [thread:$0]  (!%p1711_p10), %s1705_s13, 128, %s1707_s16, %s297_s19  }
  0xac   : > { %p1880_p11 = scmp.ne.s32.totalorder %s1868_s29, 0 }
  0xad   : > { %s1743_s1 = sand.u32 (!%p1880_p11), 1, %s1425_s22  }
  0xae   : > { %316 = sbr.rel (%p1880_p11) target bundleno = 670 (0x29e), region = 44  ;;  %s815_s11 = sshll.u32 (!%p1880_p11), %s1743_s1, 3 }
  0xaf   : > { %s319_s14 = scalar_lea.sflag (!%p1880_p11), [#allocation4], %s1743_s1  ;;  %s1749_s15 = scalar_lea.vmem (!%p1880_p11), [#allocation3], %s815_s11 }
  0xb5   : > { %1400 = dma.done.wait (%p1680_p6), %s319_s14, 128  }
  0xb6   : > { %1402 = vsyncadd (%p1680_p6), %s319_s14, 4294967168  ;;  %p1881_p7 = scmp.ne.s32.totalorder %s1867_s28, 0 }
  0xb8   : > { %1404 = dma.done.wait (%p1881_p7), [#allocation7], 2064  }
  0xb9   : > { %1406 = vsyncadd (%p1881_p7), [#allocation7], 4294965232 }
  0xba   : > { %1408 = dma.done.wait (%p1881_p7), [#allocation10], 4096  }
  0xbb   : > { %1410 = vsyncadd (%p1881_p7), [#allocation10], 4294963200 }
  0xbc   : > { %1412 = dma.done.wait (%p1881_p7), [#allocation13], 16  }
  0xbd   : > { %1414 = vsyncadd (%p1881_p7), [#allocation13], 4294967280  ;;  %v1451_v0 = vmov 0.0|0.0   ;;  %vm1452_vm0 = vmmov 0   ;;  %v1453_v1 = vmov 0.0   ;;  %v376_v2 = vld [vmem:[#allocation6] sm:$0xff] }
  0xbe   : > { %984 = vmatprep.subr.bf16.mxu0 %v1451_v0  ;;  %911 = vmatprep.mubr.msk.f32.mxu0 %vm1452_vm0, %v1453_v1  ;;  %v377_v3 = vld [vmem:[#allocation6 + $0x8] sm:$0xff]  ;;  %v378_v4 = vld [vmem:[#allocation6 + $0x10] sm:$0xff]  ;;  %v379_v6 = vld [vmem:[#allocation6 + $0x18] sm:$0xff]  ;;  %s825_s28 = sshll.u32 %s1433_s24, 7  ;;  %s370_s29 = scalar_lea.vmem [#allocation14], %s815_s11 }
  0xbf   : > { %1008 = vmatprep.subr.bf16.mxu1 %v1451_v0  ;;  %946 = vmatprep.mubr.msk.f32.mxu1 %vm1452_vm0, %v1453_v1  ;;  %v985_v5 = vpack.c.bf16 %v377_v3, %v376_v2  ;;  %v988_v7 = vpack.c.bf16 %v379_v6, %v378_v4  ;;  %v380_v8 = vld [vmem:[#allocation6 + $0x20] sm:$0xff]  ;;  %v381_v9 = vld [vmem:[#allocation6 + $0x28] sm:$0xff]  ;;  %v474_v12 = vld [vmem:[#allocation11 + $0x10] sm:$0xff]  ;;  %s670_s17 = sshll.u32 %s370_s29, 4  ;;  %s1804_s8 = scalar_lea.hbm %s1859_s6, %s825_s28  ;;  %s1806_s17 = int_to_ptr.vmem [resolvable:$true] %s670_s17 }
  0xc0   : > { %v472_v10 = vld [vmem:[#allocation11] sm:$0xff]  ;;  %v473_v11 = vld [vmem:[#allocation11 + $0x8] sm:$0xff]  ;;  %v475_v13 = vld [vmem:[#allocation11 + $0x18] sm:$0xff]  ;;  %v991_v14 = vpack.c.bf16 %v381_v9, %v380_v8  ;;  %s656_s19 = scalar_lea.sflag [#allocation5], %s1743_s1  ;;  %s1347_s10 = scalar_lea.vmem %s1806_s17, 128 }
  0xc1   : > { %986 = vmatpush3.bf16.msra.mxu0 %v985_v5  ;;  %v1009_v15 = vpack.c.bf16 %v473_v11, %v472_v10  ;;  %v382_v16 = vld [vmem:[#allocation6 + $0x30] sm:$0xff]  ;;  %v383_v17 = vld [vmem:[#allocation6 + $0x38] sm:$0xff]  ;;  %v1012_v18 = vpack.c.bf16 %v475_v13, %v474_v12  ;;  %v476_v19 = vld [vmem:[#allocation11 + $0x20] sm:$0xff]  ;;  %p1348_p6 = scmp.ne.s32.totalorder %s1806_s17, %s1347_s10  ;;  %p1882_p5 = scmp.ne.s32.totalorder %s1877_s20, 0 }
  0xc2   : > { %987 = vmatprep.subr.bf16.mxu0 %v1451_v0  ;;  %v477_v20 = vld [vmem:[#allocation11 + $0x28] sm:$0xff]  ;;  %v994_v21 = vpack.c.bf16 %v383_v17, %v382_v16  ;;  %v384_v22 = vld [vmem:[#allocation6 + $0x40] sm:$0xff]  ;;  %v478_v25 = vld [vmem:[#allocation11 + $0x30] sm:$0xff]  ;;  %s1454_s24 = smov [#allocation14]  }
  0xc3   : > { %1010 = vmatpush3.bf16.msra.mxu1 %v1009_v15  ;;  %v385_v23 = vld [vmem:[#allocation6 + $0x48] sm:$0xff]  ;;  %v1015_v24 = vpack.c.bf16 %v477_v20, %v476_v19  ;;  %v479_v26 = vld [vmem:[#allocation11 + $0x38] sm:$0xff]  ;;  %v386_v28 = vld [vmem:[#allocation6 + $0x50] sm:$0xff]  ;;  %p1349_p10 = pnand %p1348_p6, %p1882_p5  ;;  %s1351_s18 = sshll.u32 %s1454_s24, 4  ;;  %s1352_s18 = int_to_ptr.vmem [resolvable:$false] %s1351_s18 }
  0xc4   : > { %1011 = vmatprep.subr.bf16.mxu1 %v1451_v0  ;;  %v997_v27 = vpack.c.bf16 %v385_v23, %v384_v22  ;;  %v387_v29 = vld [vmem:[#allocation6 + $0x58] sm:$0xff]  ;;  %v1018_v30 = vpack.c.bf16 %v479_v26, %v478_v25  ;;  %v480_v31 = vld [vmem:[#allocation11 + $0x40] sm:$0xff]  ;;  %v481_v32 = vld [vmem:[#allocation11 + $0x48] sm:$0xff]  ;;  %s1353_s27 = scalar_lea.vmem %s1352_s18, 256  ;;  %p1354_p2 = scmp.lt.s32.totalorder %s1806_s17, %s1352_s18 }
  0xc5   : > { %989 = vmatpush3.bf16.msra.mxu0 %v988_v7  ;;  %v1000_v33 = vpack.c.bf16 %v387_v29, %v386_v28  ;;  %v388_v34 = vld [vmem:[#allocation6 + $0x60] sm:$0xff]  ;;  %v389_v35 = vld [vmem:[#allocation6 + $0x68] sm:$0xff]  ;;  %v1021_v36 = vpack.c.bf16 %v481_v32, %v480_v31  ;;  %v482_v37 = vld [vmem:[#allocation11 + $0x50] sm:$0xff]  ;;  %p1350_p1 = pneg %p1349_p10  ;;  %p1355_p4 = scmp.lt.s32.totalorder %s1353_s27, %s1347_s10 }
  0xc6   : > { %990 = vmatprep.subr.bf16.mxu0 %v1451_v0  ;;  %v483_v38 = vld [vmem:[#allocation11 + $0x58] sm:$0xff]  ;;  %v1003_v39 = vpack.c.bf16 %v389_v35, %v388_v34  ;;  %v390_v40 = vld [vmem:[#allocation6 + $0x70] sm:$0xff]  ;;  %v484_v43 = vld [vmem:[#allocation11 + $0x60] sm:$0xff] }
  0xc7   : > { %1013 = vmatpush3.bf16.msra.mxu1 %v1012_v18  ;;  %v391_v41 = vld [vmem:[#allocation6 + $0x78] sm:$0xff]  ;;  %v1024_v42 = vpack.c.bf16 %v483_v38, %v482_v37  ;;  %v485_v44 = vld [vmem:[#allocation11 + $0x68] sm:$0xff]  ;;  %v559_v51 = vld [vmem:[#allocation9] sm:$0xff]  ;;  %p1356_p9 = por %p1355_p4, %p1354_p2 }
  0xc8   : > { %1014 = vmatprep.subr.bf16.mxu1 %v1451_v0  ;;  %v1006_v45 = vpack.c.bf16 %v391_v41, %v390_v40  ;;  %v1027_v46 = vpack.c.bf16 %v485_v44, %v484_v43  ;;  %v486_v47 = vld [vmem:[#allocation11 + $0x70] sm:$0xff]  ;;  %v487_v48 = vld [vmem:[#allocation11 + $0x78] sm:$0xff]  ;;  %v560_v52 = vld [vmem:[#allocation9 + $0x8] sm:$0xff] }
  0xc9   : > { %992 = vmatpush3.bf16.msra.mxu0 %v991_v14  ;;  %v375_v49 = vld [vmem:[%s1749_s15] sm:$0xff]  ;;  %v1030_v50 = vpack.c.bf16 %v487_v48, %v486_v47  ;;  %v1033_v53 = vpack.c.bf16 %v560_v52, %v559_v51  ;;  %v563_v57 = vld [vmem:[#allocation9 + $0x20] sm:$0xff]  ;;  %v822_v12 = vld [vmem:[#allocation8] ss:$0 sm:$0xff]  ;;  %p1357_p8 = pnand %p1356_p9, %p1350_p1 }
  0xca   : > { %993 = vmatprep.subr.bf16.mxu0 %v1451_v0  ;;  %v561_v54 = vld [vmem:[#allocation9 + $0x10] sm:$0xff]  ;;  %v562_v55 = vld [vmem:[#allocation9 + $0x18] sm:$0xff]  ;;  %v564_v58 = vld [vmem:[#allocation9 + $0x28] sm:$0xff] }
  0xcb   : > { %1016 = vmatpush3.bf16.msra.mxu1 %v1015_v24  ;;  %v1036_v56 = vpack.c.bf16 %v562_v55, %v561_v54  ;;  %v1039_v59 = vpack.c.bf16 %v564_v58, %v563_v57  ;;  %v565_v60 = vld [vmem:[#allocation9 + $0x30] sm:$0xff]  ;;  %v566_v61 = vld [vmem:[#allocation9 + $0x38] sm:$0xff]  ;;  %v567_v63 = vld [vmem:[#allocation9 + $0x40] sm:$0xff] }
  0xcc   : > { %1017 = vmatprep.subr.bf16.mxu1 %v1451_v0  ;;  %v1042_v62 = vpack.c.bf16 %v566_v61, %v565_v60  ;;  %v568_v2 = vld [vmem:[#allocation9 + $0x48] sm:$0xff]  ;;  %v570_v4 = vld [vmem:[#allocation9 + $0x58] sm:$0xff]  ;;  %v571_v6 = vld [vmem:[#allocation9 + $0x60] sm:$0xff] }
  0xcd   : > { %995 = vmatpush3.bf16.msra.mxu0 %v994_v21  ;;  %v1045_v3 = vpack.c.bf16 %v568_v2, %v567_v63  ;;  %v572_v7 = vld [vmem:[#allocation9 + $0x68] sm:$0xff]  ;;  %v573_v9 = vld [vmem:[#allocation9 + $0x70] sm:$0xff]  ;;  %v574_v10 = vld [vmem:[#allocation9 + $0x78] sm:$0xff] }
  0xce   : > { %996 = vmatprep.subr.bf16.mxu0 %v1451_v0  ;;  %v1051_v8 = vpack.c.bf16 %v572_v7, %v571_v6  ;;  %v1054_v11 = vpack.c.bf16 %v574_v10, %v573_v9  ;;  %v823_v17 = vld [vmem:[#allocation12] ss:$0 sm:$0xff] }
  0xcf   : > { %1019 = vmatpush3.bf16.msra.mxu1 %v1018_v30 }
  0xd0   : > { %1020 = vmatprep.subr.bf16.mxu1 %v1451_v0 }
  0xd1   : > { %998 = vmatpush3.bf16.msra.mxu0 %v997_v27 }
  0xd2   : > { %999 = vmatprep.subr.bf16.mxu0 %v1451_v0 }
  0xd3   : > { %1022 = vmatpush3.bf16.msra.mxu1 %v1021_v36 }
  0xd4   : > { %1023 = vmatprep.subr.bf16.mxu1 %v1451_v0 }
  0xd5   : > { %1001 = vmatpush3.bf16.msra.mxu0 %v1000_v33 }
  0xd6   : > { %1002 = vmatprep.subr.bf16.mxu0 %v1451_v0 }
  0xd7   : > { %1025 = vmatpush3.bf16.msra.mxu1 %v1024_v42 }
  0xd8   : > { %1026 = vmatprep.subr.bf16.mxu1 %v1451_v0 }
  0xd9   : > { %1004 = vmatpush3.bf16.msra.mxu0 %v1003_v39 }
  0xda   : > { %1005 = vmatprep.subr.bf16.mxu0 %v1451_v0 }
  0xdb   : > { %1028 = vmatpush3.bf16.msra.mxu1 %v1027_v46 }
  0xdc   : > { %1029 = vmatprep.subr.bf16.mxu1 %v1451_v0 }
  0xdd   : > { %1007 = vmatpush3.bf16.msra.mxu0 %v1006_v45 }
  0xdf   : > { %1031 = vmatpush3.bf16.msra.mxu1 %v1030_v50 }
  0xe0   : > { %912 = vmatmul.mubr.f32.vlgmr.msra.gmra.mrb[0].mxu0 %v375_v49  ;;  %1032 = vmatprep.subr.bf16.mxu1 %v1451_v0 }
  0xe2   : > { %947 = vmatmul.mubr.f32.vlgmr.msra.gmra.mrb[0].mxu1 %v375_v49 }
  0xe3   : > { %1034 = vmatpush3.bf16.msra.mxu1 %v1033_v53  ;;  %981 = vmatprep.mubr.msk.f32.mxu1 %vm1452_vm0, %v1453_v1  ;;  %v569_v1 = vld [vmem:[#allocation9 + $0x50] sm:$0xff] }
  0xe4   : > { %1035 = vmatprep.subr.bf16.mxu1 %v1451_v0  ;;  %v1048_v5 = vpack.c.bf16 %v570_v4, %v569_v1 }
  0xe7   : > { %1037 = vmatpush3.bf16.msra.mxu1 %v1036_v56 }
  0xe8   : > { %1038 = vmatprep.subr.bf16.mxu1 %v1451_v0 }
  0xeb   : > { %1040 = vmatpush3.bf16.msra.mxu1 %v1039_v59 }
  0xec   : > { %1041 = vmatprep.subr.bf16.mxu1 %v1451_v0 }
  0xef   : > { %1043 = vmatpush3.bf16.msra.mxu1 %v1042_v62 }
  0xf0   : > { %1044 = vmatprep.subr.bf16.mxu1 %v1451_v0 }
  0xf3   : > { %1046 = vmatpush3.bf16.msra.mxu1 %v1045_v3 }
  0xf4   : > { %1047 = vmatprep.subr.bf16.mxu1 %v1451_v0 }
  0xf7   : > { %1049 = vmatpush3.bf16.msra.mxu1 %v1048_v5 }
  0xf8   : > { %1050 = vmatprep.subr.bf16.mxu1 %v1451_v0 }
  0xfb   : > { %1052 = vmatpush3.bf16.msra.mxu1 %v1051_v8 }
  0xfc   : > { %1053 = vmatprep.subr.bf16.mxu1 %v1451_v0 }
  0xff   : > { %1055 = vmatpush3.bf16.msra.mxu1 %v1054_v11 }
 0x1b3   : > { %v465_v13 = vpop.f32.mrb[0].mxu0 }
 0x1b4   : > { %v466_v14 = vadd.f32 %v822_v12, %v465_v13  ;;  %v913_v15 = vpop.f32.mrb[1].mxu0 }
 0x1b6   : > { %v469_v16 = vmax.f32 %v466_v14, 0.0 }
 0x1b8   : > { %982 = vmatmul.mubr.f32.vlgmr.msra.gmra.mrb[0].mxu1 %v469_v16 }
 0x28b   : > { %v648_v18 = vpop.f32.mrb[0].mxu1 }
 0x28c   : > { %v649_v19 = vadd.f32 %v823_v17, %v648_v18  ;;  %v983_v0 = vpop.f32.mrb[1].mxu1 }
 0x28e   : > { %v653_v20 = vmax.f32 %v649_v19, 0.0 }
 0x290   : > { %654 = vst [vmem:[%s370_s29] sm:$0xff] %v653_v20 }
 0x291   : > { %1360 = shalt.err (!%p1357_p8)
}
 0x292   : > { %s1361_s12 = scalar_lea.hbm %s1804_s8, 128  ;;  %s1365_s14 = scalar_lea.hbm %s1859_s6, 256 }
 0x293   : > { %p1362_p3 = scmp.ne.s32.totalorder %s1804_s8, %s1361_s12  ;;  %p1366_p0 = scmp.lt.u32.totalorder %s1804_s8, %s1859_s6 }
 0x294   : > { %p1367_p11 = scmp.lt.u32.totalorder %s1365_s14, %s1361_s12  ;;  %p1369_p6 = scmp.lt.u32.totalorder %s1361_s12, %s1804_s8 }
 0x295   : > { %p1363_p12 = pnand %p1362_p3, %p1882_p5 }
 0x296   : > { %p1368_p7 = por %p1367_p11, %p1366_p0 }
 0x297   : > { %p1364_p13 = pneg %p1363_p12 }
 0x298   : > { %p1370_p10 = por %p1369_p6, %p1368_p7 }
 0x29a   : > { %p1371_p1 = pnand %p1370_p10, %p1364_p13 }
 0x29c   : > { %1374 = shalt.err (!%p1371_p1)
}
 0x29d   : > { %1081 = dma.vmem_to_hbm [thread:$0]  (%p1882_p5), %s1806_s17, 128, %s1804_s8, %s656_s19  }
 0x29e PF: > { %s682_s29 = sand.u32 1, %s1421_s21   ;;  %p1883_p2 = scmp.ne.s32.totalorder %s1878_s7, 0 }
 0x29f   : > { %p1884_p4 = scmp.ge.s32.totalorder %s1441_s26, 2  ;;  %s683_s13 = scalar_lea.sflag [#allocation5], %s682_s29 }
 0x2a1   : > { %p1104_p9 = pnand %p1884_p4, %p1883_p2 }
 0x2a3   : > { %1416 = dma.done.wait (!%p1104_p9), %s683_s13, 128  }
 0x2a4   : > { %1418 = vsyncadd (!%p1104_p9), %s683_s13, 4294967168  ;;  %s25_s26 = sadd.s32 1, %s1441_s26   ;;  %s1885_s21 = smov %s1425_s22 }
 0x2a5   : > { %p22_p8 = scmp.ge.s32.totalorder %s25_s26, 4   ;;  %s1886_s22 = smov %s1429_s23 }
 0x2a6   : > { %s1887_s23 = smov %s1694_s30  ;;  %s1888_s24 = smov %s1437_s25 }
 0x2a7   : > { %s1889_s25 = smov %s1891_s9  ;;  %24 = sbr.rel (!%p22_p8) target bundleno = 11 (0xb), region = 116 }
 0x2ae   :  { %688 = vsyncpa [#allocation4], 1 }
 0x2af   :  { %690 = vsyncpa [#allocation4 + $0x1], 1 }
 0x2b0   :  { %691 = vsyncpa [#allocation7], 1 }
 0x2b1   :  { %692 = vsyncpa [#allocation10], 1 }
 0x2b2   :  { %693 = vsyncpa [#allocation13], 1 }
 0x2b3   :  { %694 = vsyncpa [#allocation5], 1 }
 0x2b4   :  { %696 = vsyncpa [#allocation5 + $0x1], 1 }

</bundles_post_ra>
